<compile_context>
chip_gen: v7x
topology: tpu7x:2x2x1
jax: 0.10.0
libtpu: 0.0.40
codegen_flags: <defaults>
</compile_context>

<pallas_src>
import jax
import jax.numpy as jnp
from jax.experimental import pallas as pl
from jax.experimental.pallas import tpu as pltpu

LANES = 128             # pad every matmul N (and K) dim to a multiple of this
CONV_TILE_M_MAX = 512   # rows of the pooled-output matrix per grid step


def _round_up(x, m):
    return (x + m - 1) // m * m


# ---------------------------------------------------------------------------
# Pallas kernels
# ---------------------------------------------------------------------------
def _conv_relu_pool_kernel(a_ref, w_ref, b_ref, o_ref):
    """Fused conv (im2col matmul) + bias + ReLU + 2x2 max-pool.

    a_ref: (4, tile_m, Kp) bf16 -- the four pool-quarter patch matrices; row r
           of every quarter corresponds to the same pooled output position.
    w_ref: (Kp, 128) bf16;  b_ref: (1, 128) f32;  o_ref: (tile_m, 128) bf16.
    """
    w = w_ref[...]
    y = jnp.dot(a_ref[0], w, preferred_element_type=jnp.float32)
    y = jnp.maximum(y, jnp.dot(a_ref[1], w, preferred_element_type=jnp.float32))
    y = jnp.maximum(y, jnp.dot(a_ref[2], w, preferred_element_type=jnp.float32))
    y = jnp.maximum(y, jnp.dot(a_ref[3], w, preferred_element_type=jnp.float32))
    o_ref[...] = jnp.maximum(y + b_ref[...], 0.0).astype(o_ref.dtype)


def conv_relu_pool_pallas(a, w, b):
    """a: (4, Mq, Kp) bf16, w: (Kp, 128) bf16, b: (1, 128) f32 -> (Mq, 128) bf16."""
    _, mq, kp = a.shape
    n = w.shape[1]
    tile_m = mq if mq <= CONV_TILE_M_MAX else CONV_TILE_M_MAX
    grid = (pl.cdiv(mq, tile_m),)
    return pl.pallas_call(
        _conv_relu_pool_kernel,
        out_shape=jax.ShapeDtypeStruct((mq, n), jnp.bfloat16),
        grid=grid,
        in_specs=[
            pl.BlockSpec((4, tile_m, kp), lambda i: (0, i, 0)),
            pl.BlockSpec((kp, n), lambda i: (0, 0)),
            pl.BlockSpec((1, n), lambda i: (0, 0)),
        ],
        out_specs=pl.BlockSpec((tile_m, n), lambda i: (i, 0)),
        compiler_params=pltpu.CompilerParams(dimension_semantics=("parallel",)),
    )(a, w, b)


def _fc_stack_kernel(x_ref, w1_ref, b1_ref, w2_ref, b2_ref, w3_ref, b3_ref, o_ref):
    """Fused fc1+ReLU -> fc2+ReLU -> fc3; intermediates never leave VMEM."""
    h = jnp.dot(x_ref[...], w1_ref[...], preferred_element_type=jnp.float32)
    h = jnp.maximum(h + b1_ref[...], 0.0).astype(w2_ref.dtype)
    h = jnp.dot(h, w2_ref[...], preferred_element_type=jnp.float32)
    h = jnp.maximum(h + b2_ref[...], 0.0).astype(w3_ref.dtype)
    y = jnp.dot(h, w3_ref[...], preferred_element_type=jnp.float32)
    o_ref[...] = y + b3_ref[...]


def fc_stack_pallas(x, w1, b1, w2, b2, w3, b3):
    m = x.shape[0]
    n = w3.shape[1]

    def full(shape):
        return pl.BlockSpec(shape, lambda i: (0,) * len(shape))

    return pl.pallas_call(
        _fc_stack_kernel,
        out_shape=jax.ShapeDtypeStruct((m, n), jnp.float32),
        grid=(1,),
        in_specs=[full(x.shape), full(w1.shape), full(b1.shape),
                  full(w2.shape), full(b2.shape), full(w3.shape), full(b3.shape)],
        out_specs=full((m, n)),
    )(x, w1, b1, w2, b2, w3, b3)


# ---------------------------------------------------------------------------
# XLA-side glue: pool-quartered im2col (NHWC), one-time weight repacking
# ---------------------------------------------------------------------------
def im2col_pool_quarters(x_nhwc, k, k_pad):
    """NHWC input -> (4, B*Ho2*Wo2, k_pad) bf16 pool-quarter patch matrices.

    Columns are in (kh, kw, cin) order; quarter (dh*2+dw) holds the patches of
    conv-output positions (2i+dh, 2j+dw), so row r of every quarter maps to the
    same pooled output position (b, i, j).
    """
    B, H, W, C = x_nhwc.shape
    Ho, Wo = H - k + 1, W - k + 1
    assert Ho % 2 == 0 and Wo % 2 == 0, "2x2 max-pool needs an even conv output"
    Ho2, Wo2 = Ho // 2, Wo // 2
    cols = [x_nhwc[:, kh:kh + Ho, kw:kw + Wo, :] for kh in range(k) for kw in range(k)]
    p = jnp.stack(cols, axis=3).reshape(B, Ho, Wo, k * k * C)
    quarters = [
        p[:, dh::2, dw::2, :].reshape(B * Ho2 * Wo2, k * k * C)
        for dh in (0, 1) for dw in (0, 1)
    ]
    a = jnp.stack(quarters, axis=0).astype(jnp.bfloat16)
    kk = k * k * C
    if k_pad > kk:
        a = jnp.pad(a, ((0, 0), (0, 0), (0, k_pad - kk)))
    return a, Ho2, Wo2


def init_params(key):
    """PyTorch-style uniform(-1/sqrt(fan_in), 1/sqrt(fan_in)) init."""
    def uniform(k, shape, fan_in):
        bound = 1.0 / float(fan_in) ** 0.5
        return jax.random.uniform(k, shape, jnp.float32, -bound, bound)

    ks = jax.random.split(key, 10)
    return {
        "conv1_w": uniform(ks[0], (6, 3, 5, 5), 3 * 5 * 5),
        "conv1_b": uniform(ks[1], (6,), 3 * 5 * 5),
        "conv2_w": uniform(ks[2], (16, 6, 5, 5), 6 * 5 * 5),
        "conv2_b": uniform(ks[3], (16,), 6 * 5 * 5),
        "fc1_w": uniform(ks[4], (120, 16 * 5 * 5), 16 * 5 * 5),
        "fc1_b": uniform(ks[5], (120,), 16 * 5 * 5),
        "fc2_w": uniform(ks[6], (84, 120), 120),
        "fc2_b": uniform(ks[7], (84,), 120),
        "fc3_w": uniform(ks[8], (10, 84), 84),
        "fc3_b": uniform(ks[9], (10,), 84),
    }


def _pad2d(m, rows, cols, dtype):
    out = jnp.zeros((rows, cols), dtype)
    return out.at[: m.shape[0], : m.shape[1]].set(m.astype(dtype))


def _pad_bias(b, cols):
    return jnp.zeros((1, cols), jnp.float32).at[0, : b.shape[0]].set(b.astype(jnp.float32))


def prepare_params(p):
    """One-time repacking: (K, N) layout, K/N padded to lane-friendly sizes,
    fc1 columns permuted from NCHW-flatten to NHWC-flatten order, bf16 cast."""
    def conv_w(w):  # (Cout, Cin, k, k) -> (Kp, 128), rows in (kh, kw, cin) order
        cout, cin, k, _ = w.shape
        w2d = w.transpose(2, 3, 1, 0).reshape(k * k * cin, cout)
        return _pad2d(w2d, _round_up(k * k * cin, LANES), LANES, jnp.bfloat16)

    fc1 = p["fc1_w"].reshape(120, 16, 5, 5).transpose(0, 2, 3, 1).reshape(120, 400).T
    return {
        "conv1_w": conv_w(p["conv1_w"]), "conv1_b": _pad_bias(p["conv1_b"], LANES),
        "conv2_w": conv_w(p["conv2_w"]), "conv2_b": _pad_bias(p["conv2_b"], LANES),
        "fc1_w": _pad2d(fc1, 400, LANES, jnp.bfloat16),
        "fc1_b": _pad_bias(p["fc1_b"], LANES),
        "fc2_w": _pad2d(p["fc2_w"].T, LANES, LANES, jnp.bfloat16),
        "fc2_b": _pad_bias(p["fc2_b"], LANES),
        "fc3_w": _pad2d(p["fc3_w"].T, LANES, LANES, jnp.bfloat16),
        "fc3_b": _pad_bias(p["fc3_b"], LANES),
    }


# ---------------------------------------------------------------------------
# Forward pass
# ---------------------------------------------------------------------------
@jax.jit
def net_forward(prepped, x_nchw):
    B = x_nchw.shape[0]
    x = jnp.transpose(x_nchw, (0, 2, 3, 1))                       # NCHW -> NHWC (once)

    a1, ph1, pw1 = im2col_pool_quarters(x, 5, prepped["conv1_w"].shape[0])
    y = conv_relu_pool_pallas(a1, prepped["conv1_w"], prepped["conv1_b"])
    y = y[:, :6].reshape(B, ph1, pw1, 6)                          # (B,14,14,6) NHWC bf16

    a2, ph2, pw2 = im2col_pool_quarters(y, 5, prepped["conv2_w"].shape[0])
    y = conv_relu_pool_pallas(a2, prepped["conv2_w"], prepped["conv2_b"])
    y = y[:, :16].reshape(B, ph2, pw2, 16)                        # (B,5,5,16) NHWC bf16

    xf = y.reshape(B, ph2 * pw2 * 16)                             # (h,w,c) flatten, bf16
    out = fc_stack_pallas(xf,
                          prepped["fc1_w"], prepped["fc1_b"],
                          prepped["fc2_w"], prepped["fc2_b"],
                          prepped["fc3_w"], prepped["fc3_b"])
    return out[:, :10]                                            # strip lane padding


def net_reference(params, x):
    """Pure-JAX reference (PyTorch semantics, NCHW) for a sanity check."""
    def conv(x, w, b):
        y = jax.lax.conv_general_dilated(
            x, w, window_strides=(1, 1), padding="VALID",
            dimension_numbers=("NCHW", "OIHW", "NCHW"))
        return y + b.reshape(1, -1, 1, 1)

    def pool(x):
        b, c, h, w = x.shape
        return jnp.max(x.reshape(b, c, h // 2, 2, w // 2, 2), axis=(3, 5))

    x = pool(jax.nn.relu(conv(x, params["conv1_w"], params["conv1_b"])))
    x = pool(jax.nn.relu(conv(x, params["conv2_w"], params["conv2_b"])))
    x = x.reshape(x.shape[0], -1)
    x = jax.nn.relu(x @ params["fc1_w"].T + params["fc1_b"])
    x = jax.nn.relu(x @ params["fc2_w"].T + params["fc2_b"])
    return x @ params["fc3_w"].T + params["fc3_b"]


if __name__ == "__main__":
    key = jax.random.PRNGKey(0)
    k_param, k_input = jax.random.split(key)
    params = init_params(k_param)
    prepped = prepare_params(params)
    # Spatial size 32x32 is implied by fc1 = Linear(16*5*5, 120).
    x = jax.random.normal(k_input, (2, 3, 32, 32), dtype=jnp.float32)
    out = jax.block_until_ready(net_forward(prepped, x))
    assert out.shape == (2, 10) and out.dtype == jnp.float32
    assert bool(jnp.all(jnp.isfinite(out)))
    ref = net_reference(params, x)
    # bf16 operands (f32 accumulation) -> loose tolerance vs f32 reference.
    assert bool(jnp.allclose(out, ref, atol=5e-2, rtol=5e-2)), float(
        jnp.max(jnp.abs(out - ref)))
    print("KERNEL_OK")
</pallas_src>

<mosaic_0001>
module attributes {stable_mosaic.version = 11 : i64} {
  func.func @_conv_relu_pool_kernel(%arg0: i32, %arg1: memref<4x392x128xbf16, #tpu.memory_space<vmem>>, %arg2: memref<128x128xbf16, #tpu.memory_space<vmem>>, %arg3: memref<1x128xf32, #tpu.memory_space<vmem>>, %arg4: memref<392x128xbf16, #tpu.memory_space<vmem>>) attributes {dimension_semantics = [#tpu.dimension_semantics<parallel>], iteration_bounds = array<i64: 1>, scalar_prefetch = 0 : i64, scratch_operands = 0 : i64, tpu.core_type = #tpu.core_type<tc>, window_params = [{transform_indices = @transform_0, window_bounds = array<i64: 4, 392, 128>}, {pipeline_mode = #tpu.pipeline_mode<synchronous>, transform_indices = @transform_1, window_bounds = array<i64: 128, 128>}, {pipeline_mode = #tpu.pipeline_mode<synchronous>, transform_indices = @transform_2, window_bounds = array<i64: 1, 128>}, {transform_indices = @transform_3, window_bounds = array<i64: 392, 128>}]} {
    %c0 = arith.constant 0 : index
    %c0_0 = arith.constant 0 : index
    %0 = vector.load %arg2[%c0, %c0_0] : memref<128x128xbf16, #tpu.memory_space<vmem>>, vector<128x128xbf16>
    %c0_1 = arith.constant 0 : index
    %c0_2 = arith.constant 0 : index
    %c0_3 = arith.constant 0 : index
    %1 = vector.load %arg1[%c0_1, %c0_2, %c0_3] : memref<4x392x128xbf16, #tpu.memory_space<vmem>>, vector<1x392x128xbf16>
    %2 = vector.shape_cast %1 : vector<1x392x128xbf16> to vector<392x128xbf16>
    %cst = arith.constant dense<0.000000e+00> : vector<392x128xf32>
    %3 = tpu.matmul %2, %0, %cst {dimension_numbers = #tpu.dot_dimension_numbers<[1], [0], [0], [1], [0, 0, 1, 1], [], []>} : vector<392x128xbf16>, vector<128x128xbf16>, vector<392x128xf32> -> vector<392x128xf32>
    %c1 = arith.constant 1 : index
    %c0_4 = arith.constant 0 : index
    %c0_5 = arith.constant 0 : index
    %4 = vector.load %arg1[%c1, %c0_4, %c0_5] : memref<4x392x128xbf16, #tpu.memory_space<vmem>>, vector<1x392x128xbf16>
    %5 = vector.shape_cast %4 : vector<1x392x128xbf16> to vector<392x128xbf16>
    %cst_6 = arith.constant dense<0.000000e+00> : vector<392x128xf32>
    %6 = tpu.matmul %5, %0, %cst_6 {dimension_numbers = #tpu.dot_dimension_numbers<[1], [0], [0], [1], [0, 0, 1, 1], [], []>} : vector<392x128xbf16>, vector<128x128xbf16>, vector<392x128xf32> -> vector<392x128xf32>
    %7 = arith.maximumf %3, %6 : vector<392x128xf32>
    %c2 = arith.constant 2 : index
    %c0_7 = arith.constant 0 : index
    %c0_8 = arith.constant 0 : index
    %8 = vector.load %arg1[%c2, %c0_7, %c0_8] : memref<4x392x128xbf16, #tpu.memory_space<vmem>>, vector<1x392x128xbf16>
    %9 = vector.shape_cast %8 : vector<1x392x128xbf16> to vector<392x128xbf16>
    %cst_9 = arith.constant dense<0.000000e+00> : vector<392x128xf32>
    %10 = tpu.matmul %9, %0, %cst_9 {dimension_numbers = #tpu.dot_dimension_numbers<[1], [0], [0], [1], [0, 0, 1, 1], [], []>} : vector<392x128xbf16>, vector<128x128xbf16>, vector<392x128xf32> -> vector<392x128xf32>
    %11 = arith.maximumf %7, %10 : vector<392x128xf32>
    %c3 = arith.constant 3 : index
    %c0_10 = arith.constant 0 : index
    %c0_11 = arith.constant 0 : index
    %12 = vector.load %arg1[%c3, %c0_10, %c0_11] : memref<4x392x128xbf16, #tpu.memory_space<vmem>>, vector<1x392x128xbf16>
    %13 = vector.shape_cast %12 : vector<1x392x128xbf16> to vector<392x128xbf16>
    %cst_12 = arith.constant dense<0.000000e+00> : vector<392x128xf32>
    %14 = tpu.matmul %13, %0, %cst_12 {dimension_numbers = #tpu.dot_dimension_numbers<[1], [0], [0], [1], [0, 0, 1, 1], [], []>} : vector<392x128xbf16>, vector<128x128xbf16>, vector<392x128xf32> -> vector<392x128xf32>
    %15 = arith.maximumf %11, %14 : vector<392x128xf32>
    %c0_13 = arith.constant 0 : index
    %c0_14 = arith.constant 0 : index
    %16 = vector.load %arg3[%c0_13, %c0_14] : memref<1x128xf32, #tpu.memory_space<vmem>>, vector<1x128xf32>
    %17 = vector.broadcast %16 : vector<1x128xf32> to vector<392x128xf32>
    %18 = arith.addf %15, %17 : vector<392x128xf32>
    %cst_15 = arith.constant 0.000000e+00 : f32
    %19 = vector.broadcast %cst_15 : f32 to vector<392x128xf32>
    %20 = arith.maximumf %18, %19 : vector<392x128xf32>
    %21 = arith.truncf %20 : vector<392x128xf32> to vector<392x128xbf16>
    %c0_16 = arith.constant 0 : index
    %c0_17 = arith.constant 0 : index
    %22 = vector.load %arg4[%c0_16, %c0_17] : memref<392x128xbf16, #tpu.memory_space<vmem>>, vector<392x128xbf16>
    tpu.vector_store %arg4[%c0_16, %c0_17], %21 {strides = array<i32>} : memref<392x128xbf16, #tpu.memory_space<vmem>>, vector<392x128xbf16>,
    return
  }
  func.func @transform_0(%arg0: i32) -> (i32, i32, i32) {
    %c0_i32 = arith.constant 0 : i32
    %c0_i32_0 = arith.constant 0 : i32
    %c0_i32_1 = arith.constant 0 : i32
    return %c0_i32, %arg0, %c0_i32_0 : i32, i32, i32
  }
  func.func @transform_1(%arg0: i32) -> (i32, i32) {
    %c0_i32 = arith.constant 0 : i32
    %c0_i32_0 = arith.constant 0 : i32
    %c0_i32_1 = arith.constant 0 : i32
    return %c0_i32, %c0_i32_0 : i32, i32
  }
  func.func @transform_2(%arg0: i32) -> (i32, i32) {
    %c0_i32 = arith.constant 0 : i32
    %c0_i32_0 = arith.constant 0 : i32
    %c0_i32_1 = arith.constant 0 : i32
    return %c0_i32, %c0_i32_0 : i32, i32
  }
  func.func @transform_3(%arg0: i32) -> (i32, i32) {
    %c0_i32 = arith.constant 0 : i32
    %c0_i32_0 = arith.constant 0 : i32
    return %arg0, %c0_i32 : i32, i32
  }
}

module attributes {stable_mosaic.version = 11 : i64} {
  func.func @_conv_relu_pool_kernel(%arg0: i32, %arg1: memref<4x50x256xbf16, #tpu.memory_space<vmem>>, %arg2: memref<256x128xbf16, #tpu.memory_space<vmem>>, %arg3: memref<1x128xf32, #tpu.memory_space<vmem>>, %arg4: memref<50x128xbf16, #tpu.memory_space<vmem>>) attributes {dimension_semantics = [#tpu.dimension_semantics<parallel>], iteration_bounds = array<i64: 1>, scalar_prefetch = 0 : i64, scratch_operands = 0 : i64, tpu.core_type = #tpu.core_type<tc>, window_params = [{transform_indices = @transform_0, window_bounds = array<i64: 4, 50, 256>}, {pipeline_mode = #tpu.pipeline_mode<synchronous>, transform_indices = @transform_1, window_bounds = array<i64: 256, 128>}, {pipeline_mode = #tpu.pipeline_mode<synchronous>, transform_indices = @transform_2, window_bounds = array<i64: 1, 128>}, {transform_indices = @transform_3, window_bounds = array<i64: 50, 128>}]} {
    %c0 = arith.constant 0 : index
    %c0_0 = arith.constant 0 : index
    %0 = vector.load %arg2[%c0, %c0_0] : memref<256x128xbf16, #tpu.memory_space<vmem>>, vector<256x128xbf16>
    %c0_1 = arith.constant 0 : index
    %c0_2 = arith.constant 0 : index
    %c0_3 = arith.constant 0 : index
    %1 = vector.load %arg1[%c0_1, %c0_2, %c0_3] : memref<4x50x256xbf16, #tpu.memory_space<vmem>>, vector<1x50x256xbf16>
    %2 = vector.shape_cast %1 : vector<1x50x256xbf16> to vector<50x256xbf16>
    %cst = arith.constant dense<0.000000e+00> : vector<50x128xf32>
    %3 = tpu.matmul %2, %0, %cst {dimension_numbers = #tpu.dot_dimension_numbers<[1], [0], [0], [1], [0, 0, 1, 1], [], []>} : vector<50x256xbf16>, vector<256x128xbf16>, vector<50x128xf32> -> vector<50x128xf32>
    %c1 = arith.constant 1 : index
    %c0_4 = arith.constant 0 : index
    %c0_5 = arith.constant 0 : index
    %4 = vector.load %arg1[%c1, %c0_4, %c0_5] : memref<4x50x256xbf16, #tpu.memory_space<vmem>>, vector<1x50x256xbf16>
    %5 = vector.shape_cast %4 : vector<1x50x256xbf16> to vector<50x256xbf16>
    %cst_6 = arith.constant dense<0.000000e+00> : vector<50x128xf32>
    %6 = tpu.matmul %5, %0, %cst_6 {dimension_numbers = #tpu.dot_dimension_numbers<[1], [0], [0], [1], [0, 0, 1, 1], [], []>} : vector<50x256xbf16>, vector<256x128xbf16>, vector<50x128xf32> -> vector<50x128xf32>
    %7 = arith.maximumf %3, %6 : vector<50x128xf32>
    %c2 = arith.constant 2 : index
    %c0_7 = arith.constant 0 : index
    %c0_8 = arith.constant 0 : index
    %8 = vector.load %arg1[%c2, %c0_7, %c0_8] : memref<4x50x256xbf16, #tpu.memory_space<vmem>>, vector<1x50x256xbf16>
    %9 = vector.shape_cast %8 : vector<1x50x256xbf16> to vector<50x256xbf16>
    %cst_9 = arith.constant dense<0.000000e+00> : vector<50x128xf32>
    %10 = tpu.matmul %9, %0, %cst_9 {dimension_numbers = #tpu.dot_dimension_numbers<[1], [0], [0], [1], [0, 0, 1, 1], [], []>} : vector<50x256xbf16>, vector<256x128xbf16>, vector<50x128xf32> -> vector<50x128xf32>
    %11 = arith.maximumf %7, %10 : vector<50x128xf32>
    %c3 = arith.constant 3 : index
    %c0_10 = arith.constant 0 : index
    %c0_11 = arith.constant 0 : index
    %12 = vector.load %arg1[%c3, %c0_10, %c0_11] : memref<4x50x256xbf16, #tpu.memory_space<vmem>>, vector<1x50x256xbf16>
    %13 = vector.shape_cast %12 : vector<1x50x256xbf16> to vector<50x256xbf16>
    %cst_12 = arith.constant dense<0.000000e+00> : vector<50x128xf32>
    %14 = tpu.matmul %13, %0, %cst_12 {dimension_numbers = #tpu.dot_dimension_numbers<[1], [0], [0], [1], [0, 0, 1, 1], [], []>} : vector<50x256xbf16>, vector<256x128xbf16>, vector<50x128xf32> -> vector<50x128xf32>
    %15 = arith.maximumf %11, %14 : vector<50x128xf32>
    %c0_13 = arith.constant 0 : index
    %c0_14 = arith.constant 0 : index
    %16 = vector.load %arg3[%c0_13, %c0_14] : memref<1x128xf32, #tpu.memory_space<vmem>>, vector<1x128xf32>
    %17 = vector.broadcast %16 : vector<1x128xf32> to vector<50x128xf32>
    %18 = arith.addf %15, %17 : vector<50x128xf32>
    %cst_15 = arith.constant 0.000000e+00 : f32
    %19 = vector.broadcast %cst_15 : f32 to vector<50x128xf32>
    %20 = arith.maximumf %18, %19 : vector<50x128xf32>
    %21 = arith.truncf %20 : vector<50x128xf32> to vector<50x128xbf16>
    %c0_16 = arith.constant 0 : index
    %c0_17 = arith.constant 0 : index
    %22 = vector.load %arg4[%c0_16, %c0_17] : memref<50x128xbf16, #tpu.memory_space<vmem>>, vector<50x128xbf16>
    tpu.vector_store %arg4[%c0_16, %c0_17], %21 {strides = array<i32>} : memref<50x128xbf16, #tpu.memory_space<vmem>>, vector<50x128xbf16>,
    return
  }
  func.func @transform_0(%arg0: i32) -> (i32, i32, i32) {
    %c0_i32 = arith.constant 0 : i32
    %c0_i32_0 = arith.constant 0 : i32
    %c0_i32_1 = arith.constant 0 : i32
    return %c0_i32, %arg0, %c0_i32_0 : i32, i32, i32
  }
  func.func @transform_1(%arg0: i32) -> (i32, i32) {
    %c0_i32 = arith.constant 0 : i32
    %c0_i32_0 = arith.constant 0 : i32
    %c0_i32_1 = arith.constant 0 : i32
    return %c0_i32, %c0_i32_0 : i32, i32
  }
  func.func @transform_2(%arg0: i32) -> (i32, i32) {
    %c0_i32 = arith.constant 0 : i32
    %c0_i32_0 = arith.constant 0 : i32
    %c0_i32_1 = arith.constant 0 : i32
    return %c0_i32, %c0_i32_0 : i32, i32
  }
  func.func @transform_3(%arg0: i32) -> (i32, i32) {
    %c0_i32 = arith.constant 0 : i32
    %c0_i32_0 = arith.constant 0 : i32
    return %arg0, %c0_i32 : i32, i32
  }
}

module attributes {stable_mosaic.version = 11 : i64} {
  func.func @_fc_stack_kernel(%arg0: i32, %arg1: memref<2x400xbf16, #tpu.memory_space<vmem>>, %arg2: memref<400x128xbf16, #tpu.memory_space<vmem>>, %arg3: memref<1x128xf32, #tpu.memory_space<vmem>>, %arg4: memref<128x128xbf16, #tpu.memory_space<vmem>>, %arg5: memref<1x128xf32, #tpu.memory_space<vmem>>, %arg6: memref<128x128xbf16, #tpu.memory_space<vmem>>, %arg7: memref<1x128xf32, #tpu.memory_space<vmem>>, %arg8: memref<2x128xf32, #tpu.memory_space<vmem>>) attributes {dimension_semantics = [#tpu.dimension_semantics<arbitrary>], iteration_bounds = array<i64: 1>, scalar_prefetch = 0 : i64, scratch_operands = 0 : i64, tpu.core_type = #tpu.core_type<tc>, window_params = [{pipeline_mode = #tpu.pipeline_mode<synchronous>, transform_indices = @transform_0, window_bounds = array<i64: 2, 400>}, {pipeline_mode = #tpu.pipeline_mode<synchronous>, transform_indices = @transform_1, window_bounds = array<i64: 400, 128>}, {pipeline_mode = #tpu.pipeline_mode<synchronous>, transform_indices = @transform_2, window_bounds = array<i64: 1, 128>}, {pipeline_mode = #tpu.pipeline_mode<synchronous>, transform_indices = @transform_3, window_bounds = array<i64: 128, 128>}, {pipeline_mode = #tpu.pipeline_mode<synchronous>, transform_indices = @transform_4, window_bounds = array<i64: 1, 128>}, {pipeline_mode = #tpu.pipeline_mode<synchronous>, transform_indices = @transform_5, window_bounds = array<i64: 128, 128>}, {pipeline_mode = #tpu.pipeline_mode<synchronous>, transform_indices = @transform_6, window_bounds = array<i64: 1, 128>}, {pipeline_mode = #tpu.pipeline_mode<synchronous>, transform_indices = @transform_7, window_bounds = array<i64: 2, 128>}]} {
    %c0 = arith.constant 0 : index
    %c0_0 = arith.constant 0 : index
    %0 = vector.load %arg1[%c0, %c0_0] : memref<2x400xbf16, #tpu.memory_space<vmem>>, vector<2x400xbf16>
    %c0_1 = arith.constant 0 : index
    %c0_2 = arith.constant 0 : index
    %1 = vector.load %arg2[%c0_1, %c0_2] : memref<400x128xbf16, #tpu.memory_space<vmem>>, vector<400x128xbf16>
    %cst = arith.constant dense<0.000000e+00> : vector<2x128xf32>
    %2 = tpu.matmul %0, %1, %cst {dimension_numbers = #tpu.dot_dimension_numbers<[1], [0], [0], [1], [0, 0, 1, 1], [], []>} : vector<2x400xbf16>, vector<400x128xbf16>, vector<2x128xf32> -> vector<2x128xf32>
    %c0_3 = arith.constant 0 : index
    %c0_4 = arith.constant 0 : index
    %3 = vector.load %arg3[%c0_3, %c0_4] : memref<1x128xf32, #tpu.memory_space<vmem>>, vector<1x128xf32>
    %4 = vector.broadcast %3 : vector<1x128xf32> to vector<2x128xf32>
    %5 = arith.addf %2, %4 : vector<2x128xf32>
    %cst_5 = arith.constant 0.000000e+00 : f32
    %6 = vector.broadcast %cst_5 : f32 to vector<2x128xf32>
    %7 = arith.maximumf %5, %6 : vector<2x128xf32>
    %8 = arith.truncf %7 : vector<2x128xf32> to vector<2x128xbf16>
    %c0_6 = arith.constant 0 : index
    %c0_7 = arith.constant 0 : index
    %9 = vector.load %arg4[%c0_6, %c0_7] : memref<128x128xbf16, #tpu.memory_space<vmem>>, vector<128x128xbf16>
    %cst_8 = arith.constant dense<0.000000e+00> : vector<2x128xf32>
    %10 = tpu.matmul %8, %9, %cst_8 {dimension_numbers = #tpu.dot_dimension_numbers<[1], [0], [0], [1], [0, 0, 1, 1], [], []>} : vector<2x128xbf16>, vector<128x128xbf16>, vector<2x128xf32> -> vector<2x128xf32>
    %c0_9 = arith.constant 0 : index
    %c0_10 = arith.constant 0 : index
    %11 = vector.load %arg5[%c0_9, %c0_10] : memref<1x128xf32, #tpu.memory_space<vmem>>, vector<1x128xf32>
    %12 = vector.broadcast %11 : vector<1x128xf32> to vector<2x128xf32>
    %13 = arith.addf %10, %12 : vector<2x128xf32>
    %cst_11 = arith.constant 0.000000e+00 : f32
    %14 = vector.broadcast %cst_11 : f32 to vector<2x128xf32>
    %15 = arith.maximumf %13, %14 : vector<2x128xf32>
    %16 = arith.truncf %15 : vector<2x128xf32> to vector<2x128xbf16>
    %c0_12 = arith.constant 0 : index
    %c0_13 = arith.constant 0 : index
    %17 = vector.load %arg6[%c0_12, %c0_13] : memref<128x128xbf16, #tpu.memory_space<vmem>>, vector<128x128xbf16>
    %cst_14 = arith.constant dense<0.000000e+00> : vector<2x128xf32>
    %18 = tpu.matmul %16, %17, %cst_14 {dimension_numbers = #tpu.dot_dimension_numbers<[1], [0], [0], [1], [0, 0, 1, 1], [], []>} : vector<2x128xbf16>, vector<128x128xbf16>, vector<2x128xf32> -> vector<2x128xf32>
    %c0_15 = arith.constant 0 : index
    %c0_16 = arith.constant 0 : index
    %19 = vector.load %arg7[%c0_15, %c0_16] : memref<1x128xf32, #tpu.memory_space<vmem>>, vector<1x128xf32>
    %20 = vector.broadcast %19 : vector<1x128xf32> to vector<2x128xf32>
    %21 = arith.addf %18, %20 : vector<2x128xf32>
    %c0_17 = arith.constant 0 : index
    %c0_18 = arith.constant 0 : index
    %22 = vector.load %arg8[%c0_17, %c0_18] : memref<2x128xf32, #tpu.memory_space<vmem>>, vector<2x128xf32>
    tpu.vector_store %arg8[%c0_17, %c0_18], %21 {strides = array<i32>} : memref<2x128xf32, #tpu.memory_space<vmem>>, vector<2x128xf32>,
    return
  }
  func.func @transform_0(%arg0: i32) -> (i32, i32) {
    %c0_i32 = arith.constant 0 : i32
    %c0_i32_0 = arith.constant 0 : i32
    %c0_i32_1 = arith.constant 0 : i32
    return %c0_i32, %c0_i32_0 : i32, i32
  }
  func.func @transform_1(%arg0: i32) -> (i32, i32) {
    %c0_i32 = arith.constant 0 : i32
    %c0_i32_0 = arith.constant 0 : i32
    %c0_i32_1 = arith.constant 0 : i32
    return %c0_i32, %c0_i32_0 : i32, i32
  }
  func.func @transform_2(%arg0: i32) -> (i32, i32) {
    %c0_i32 = arith.constant 0 : i32
    %c0_i32_0 = arith.constant 0 : i32
    %c0_i32_1 = arith.constant 0 : i32
    return %c0_i32, %c0_i32_0 : i32, i32
  }
  func.func @transform_3(%arg0: i32) -> (i32, i32) {
    %c0_i32 = arith.constant 0 : i32
    %c0_i32_0 = arith.constant 0 : i32
    %c0_i32_1 = arith.constant 0 : i32
    return %c0_i32, %c0_i32_0 : i32, i32
  }
  func.func @transform_4(%arg0: i32) -> (i32, i32) {
    %c0_i32 = arith.constant 0 : i32
    %c0_i32_0 = arith.constant 0 : i32
    %c0_i32_1 = arith.constant 0 : i32
    return %c0_i32, %c0_i32_0 : i32, i32
  }
  func.func @transform_5(%arg0: i32) -> (i32, i32) {
    %c0_i32 = arith.constant 0 : i32
    %c0_i32_0 = arith.constant 0 : i32
    %c0_i32_1 = arith.constant 0 : i32
    return %c0_i32, %c0_i32_0 : i32, i32
  }
  func.func @transform_6(%arg0: i32) -> (i32, i32) {
    %c0_i32 = arith.constant 0 : i32
    %c0_i32_0 = arith.constant 0 : i32
    %c0_i32_1 = arith.constant 0 : i32
    return %c0_i32, %c0_i32_0 : i32, i32
  }
  func.func @transform_7(%arg0: i32) -> (i32, i32) {
    %c0_i32 = arith.constant 0 : i32
    %c0_i32_0 = arith.constant 0 : i32
    %c0_i32_1 = arith.constant 0 : i32
    return %c0_i32, %c0_i32_0 : i32, i32
  }
}

</mosaic_0001>

<bundles_post_ra>
// kernel: net_forward.3
= control target key start
LH: loop header
LB: loop body
LE: loop exit
PB: predicated region body
PF: predicated region fallthrough
CT: control target
= control target key end

     0   :  { %v4655_v0 = vmov 0.0   ;;  %vm3504_vm0 = vmmov 0   ;;  %s4651_s1 = inlined_call_operand.vmem [shape: bf16[128,128], index: 1, kind: input, shape index: {}]   ;;  %s4652_s0 = inlined_call_operand.vmem [shape: bf16[4,392,128], index: 0, kind: input, shape index: {}]   ;;  %s4653_s2 = inlined_call_operand.vmem [shape: f32[1,128], index: 2, kind: input, shape index: {}]   ;;  %s4654_s3 = inlined_call_operand.vmem [shape: bf16[392,128], index: 3, kind: output, shape index: {}]  }
   0x1   :  { %2929 = vmatprep.subr.bf16.mxu0 %v4655_v0  ;;  %3045 = vmatprep.subr.bf16.mxu1 %v4655_v0  ;;  %v3395_v1 = vld [vmem:[%s4651_s1] sm:$0xff]   ;;  %v3396_v2 = vld [vmem:[%s4651_s1 + $0x8] sm:$0xff]   ;;  %v3397_v3 = vld [vmem:[%s4651_s1 + $0x10] sm:$0xff]  }
   0x2   :  { %2945 = vmatprep.mubr.msk.bf16.mxu0 %vm3504_vm0, %v4655_v0  ;;  %3061 = vmatprep.mubr.msk.bf16.mxu1 %vm3504_vm0, %v4655_v0  ;;  %v3398_v4 = vld [vmem:[%s4651_s1 + $0x18] sm:$0xff]   ;;  %v3399_v5 = vld [vmem:[%s4651_s1 + $0x20] sm:$0xff]   ;;  %v3400_v6 = vld [vmem:[%s4651_s1 + $0x28] sm:$0xff]  }
   0x3   :  { %2930 = vmatpush3.bf16.msra.mxu0 %v3395_v1  ;;  %3046 = vmatpush3.bf16.msra.mxu1 %v3395_v1  ;;  %v3401_v7 = vld [vmem:[%s4651_s1 + $0x30] sm:$0xff]   ;;  %v3402_v8 = vld [vmem:[%s4651_s1 + $0x38] sm:$0xff]   ;;  %v3403_v9 = vld [vmem:[%s4652_s0] sm:$0xff]  }
   0x4   :  { %2931 = vmatprep.subr.bf16.mxu0 %v4655_v0  ;;  %3047 = vmatprep.subr.bf16.mxu1 %v4655_v0  ;;  %v3404_v10 = vld [vmem:[%s4652_s0 + $0xc4] sm:$0xff]   ;;  %v3406_v12 = vld [vmem:[%s4652_s0 + $0xcc] sm:$0xff]   ;;  %v3408_v14 = vld [vmem:[%s4652_s0 + $0xd4] sm:$0xff]  }
   0x5   :  { %v3405_v11 = vld [vmem:[%s4652_s0 + $0x8] sm:$0xff]   ;;  %v3407_v13 = vld [vmem:[%s4652_s0 + $0x10] sm:$0xff]   ;;  %v3409_v15 = vld [vmem:[%s4652_s0 + $0x18] sm:$0xff]  }
   0x6   :  { %v3410_v16 = vld [vmem:[%s4652_s0 + $0xdc] sm:$0xff]   ;;  %v3412_v18 = vld [vmem:[%s4652_s0 + $0xe4] sm:$0xff]   ;;  %v3414_v20 = vld [vmem:[%s4652_s0 + $0xec] sm:$0xff]  }
   0x7   :  { %2932 = vmatpush3.bf16.msra.mxu0 %v3396_v2  ;;  %3048 = vmatpush3.bf16.msra.mxu1 %v3396_v2  ;;  %v3411_v17 = vld [vmem:[%s4652_s0 + $0x20] sm:$0xff]   ;;  %v3413_v19 = vld [vmem:[%s4652_s0 + $0x28] sm:$0xff]   ;;  %v3415_v21 = vld [vmem:[%s4652_s0 + $0x30] sm:$0xff]  }
   0x8   :  { %2933 = vmatprep.subr.bf16.mxu0 %v4655_v0  ;;  %3049 = vmatprep.subr.bf16.mxu1 %v4655_v0  ;;  %v3416_v22 = vld [vmem:[%s4652_s0 + $0xf4] sm:$0xff]   ;;  %v3418_v24 = vld [vmem:[%s4652_s0 + $0xfc] sm:$0xff]   ;;  %v3420_v26 = vld [vmem:[%s4652_s0 + $0x104] sm:$0xff]  }
   0x9   :  { %v3417_v23 = vld [vmem:[%s4652_s0 + $0x38] sm:$0xff]   ;;  %v3419_v25 = vld [vmem:[%s4652_s0 + $0x40] sm:$0xff]   ;;  %v3421_v27 = vld [vmem:[%s4652_s0 + $0x48] sm:$0xff]  }
   0xa   :  { %v3422_v28 = vld [vmem:[%s4652_s0 + $0x10c] sm:$0xff]   ;;  %v3424_v30 = vld [vmem:[%s4652_s0 + $0x114] sm:$0xff]   ;;  %v3426_v32 = vld [vmem:[%s4652_s0 + $0x11c] sm:$0xff]  }
   0xb   :  { %2934 = vmatpush3.bf16.msra.mxu0 %v3397_v3  ;;  %3050 = vmatpush3.bf16.msra.mxu1 %v3397_v3  ;;  %v3423_v29 = vld [vmem:[%s4652_s0 + $0x50] sm:$0xff]   ;;  %v3425_v31 = vld [vmem:[%s4652_s0 + $0x58] sm:$0xff]   ;;  %v3427_v33 = vld [vmem:[%s4652_s0 + $0x60] sm:$0xff]  }
   0xc   :  { %2935 = vmatprep.subr.bf16.mxu0 %v4655_v0  ;;  %3051 = vmatprep.subr.bf16.mxu1 %v4655_v0  ;;  %v3428_v34 = vld [vmem:[%s4652_s0 + $0x124] sm:$0xff]   ;;  %v3430_v36 = vld [vmem:[%s4652_s0 + $0x12c] sm:$0xff]   ;;  %v3432_v38 = vld [vmem:[%s4652_s0 + $0x134] sm:$0xff]  }
   0xd   :  { %v3429_v35 = vld [vmem:[%s4652_s0 + $0x68] sm:$0xff]   ;;  %v3431_v37 = vld [vmem:[%s4652_s0 + $0x70] sm:$0xff]   ;;  %v3433_v39 = vld [vmem:[%s4652_s0 + $0x78] sm:$0xff]  }
   0xe   :  { %v3434_v40 = vld [vmem:[%s4652_s0 + $0x13c] sm:$0xff]   ;;  %v3436_v42 = vld [vmem:[%s4652_s0 + $0x144] sm:$0xff]   ;;  %v3438_v44 = vld [vmem:[%s4652_s0 + $0x14c] sm:$0xff]  }
   0xf   :  { %2936 = vmatpush3.bf16.msra.mxu0 %v3398_v4  ;;  %3052 = vmatpush3.bf16.msra.mxu1 %v3398_v4  ;;  %v3435_v41 = vld [vmem:[%s4652_s0 + $0x80] sm:$0xff]   ;;  %v3437_v43 = vld [vmem:[%s4652_s0 + $0x88] sm:$0xff]   ;;  %v3439_v45 = vld [vmem:[%s4652_s0 + $0x90] sm:$0xff]  }
  0x10   :  { %2937 = vmatprep.subr.bf16.mxu0 %v4655_v0  ;;  %3053 = vmatprep.subr.bf16.mxu1 %v4655_v0  ;;  %v3440_v46 = vld [vmem:[%s4652_s0 + $0x154] sm:$0xff]   ;;  %v3442_v48 = vld [vmem:[%s4652_s0 + $0x15c] sm:$0xff]   ;;  %v3444_v50 = vld [vmem:[%s4652_s0 + $0x164] sm:$0xff]  }
  0x11   :  { %v3441_v47 = vld [vmem:[%s4652_s0 + $0x98] sm:$0xff]   ;;  %v3443_v49 = vld [vmem:[%s4652_s0 + $0xa0] sm:$0xff]   ;;  %v3445_v51 = vld [vmem:[%s4652_s0 + $0xa8] sm:$0xff]  }
  0x12   :  { %v3446_v52 = vld [vmem:[%s4652_s0 + $0x16c] sm:$0xff]   ;;  %v3448_v54 = vld [vmem:[%s4652_s0 + $0x174] sm:$0xff]   ;;  %v3450_v56 = vld [vmem:[%s4652_s0 + $0x17c] sm:$0xff]  }
  0x13   :  { %2938 = vmatpush3.bf16.msra.mxu0 %v3399_v5  ;;  %3054 = vmatpush3.bf16.msra.mxu1 %v3399_v5  ;;  %v3447_v53 = vld [vmem:[%s4652_s0 + $0xb0] sm:$0xff]   ;;  %v3449_v55 = vld [vmem:[%s4652_s0 + $0xb8] sm:$0xff]   ;;  %v3451_v57 = vld [vmem:[%s4652_s0 + $0xc0] ss:$0 sps:$4 sm:$0xff]  }
  0x14   :  { %2939 = vmatprep.subr.bf16.mxu0 %v4655_v0  ;;  %3055 = vmatprep.subr.bf16.mxu1 %v4655_v0  ;;  %v3452_v58 = vld [vmem:[%s4652_s0 + $0x184] ss:$0 sps:$4 sm:$0xff]   ;;  %v3453_v59 = vld [vmem:[%s4652_s0 + $0x188] sm:$0xff]   ;;  %v3455_v61 = vld [vmem:[%s4652_s0 + $0x190] sm:$0xff]  }
  0x15   :  { %v3454_v60 = vld [vmem:[%s4652_s0 + $0x24c] sm:$0xff]   ;;  %v3456_v62 = vld [vmem:[%s4652_s0 + $0x254] sm:$0xff]  }
  0x17   :  { %2940 = vmatpush3.bf16.msra.mxu0 %v3400_v6  ;;  %3056 = vmatpush3.bf16.msra.mxu1 %v3400_v6 }
  0x18   :  { %2941 = vmatprep.subr.bf16.mxu0 %v4655_v0  ;;  %3057 = vmatprep.subr.bf16.mxu1 %v4655_v0 }
  0x1b   :  { %2942 = vmatpush3.bf16.msra.mxu0 %v3401_v7  ;;  %3058 = vmatpush3.bf16.msra.mxu1 %v3401_v7 }
  0x1c   :  { %2943 = vmatprep.subr.bf16.mxu0 %v4655_v0  ;;  %3059 = vmatprep.subr.bf16.mxu1 %v4655_v0 }
  0x1f   :  { %2944 = vmatpush3.bf16.msra.mxu0 %v3402_v8  ;;  %3060 = vmatpush3.bf16.msra.mxu1 %v3402_v8 }
  0x20   :  { %3161 = vmatprep.subr.bf16.mxu0 %v4655_v0  ;;  %3277 = vmatprep.subr.bf16.mxu1 %v4655_v0 }
  0x22   :  { %2946 = vmatmul.mubr.bf16.vlgmr.msra.gmra.mrb[0].mxu0 %v3403_v9  ;;  %3062 = vmatmul.mubr.bf16.vlgmr.msra.gmra.mrb[0].mxu1 %v3404_v10 }
  0x23   :  { %3162 = vmatpush3.bf16.msra.mxu0 %v3395_v1  ;;  %3278 = vmatpush3.bf16.msra.mxu1 %v3395_v1 }
  0x24   :  { %2949 = vmatprep.mubr.msk.bf16.mxu0 %vm3504_vm0, %v4655_v0  ;;  %3065 = vmatprep.mubr.msk.bf16.mxu1 %vm3504_vm0, %v4655_v0 }
  0x25   :  { %3163 = vmatprep.subr.bf16.mxu0 %v4655_v0  ;;  %3279 = vmatprep.subr.bf16.mxu1 %v4655_v0 }
  0x27   :  { %3164 = vmatpush3.bf16.msra.mxu0 %v3396_v2  ;;  %3280 = vmatpush3.bf16.msra.mxu1 %v3396_v2 }
  0x28   :  { %3165 = vmatprep.subr.bf16.mxu0 %v4655_v0  ;;  %3281 = vmatprep.subr.bf16.mxu1 %v4655_v0 }
  0x2a   :  { %2950 = vmatmul.mubr.bf16.gmra.mrb[4].mxu0 %v3405_v11  ;;  %3066 = vmatmul.mubr.bf16.gmra.mrb[4].mxu1 %v3406_v12 }
  0x2b   :  { %2953 = vmatprep.mubr.msk.bf16.mxu0 %vm3504_vm0, %v4655_v0  ;;  %3069 = vmatprep.mubr.msk.bf16.mxu1 %vm3504_vm0, %v4655_v0 }
  0x2c   :  { %3166 = vmatpush3.bf16.msra.mxu0 %v3397_v3  ;;  %3282 = vmatpush3.bf16.msra.mxu1 %v3397_v3 }
  0x2d   :  { %3167 = vmatprep.subr.bf16.mxu0 %v4655_v0  ;;  %3283 = vmatprep.subr.bf16.mxu1 %v4655_v0 }
  0x30   :  { %3168 = vmatpush3.bf16.msra.mxu0 %v3398_v4  ;;  %3284 = vmatpush3.bf16.msra.mxu1 %v3398_v4 }
  0x31   :  { %3169 = vmatprep.subr.bf16.mxu0 %v4655_v0  ;;  %3285 = vmatprep.subr.bf16.mxu1 %v4655_v0 }
  0x32   :  { %2954 = vmatmul.mubr.bf16.gmra.mrb[8].mxu0 %v3407_v13  ;;  %3070 = vmatmul.mubr.bf16.gmra.mrb[8].mxu1 %v3408_v14 }
  0x33   :  { %2957 = vmatprep.mubr.msk.bf16.mxu0 %vm3504_vm0, %v4655_v0  ;;  %3073 = vmatprep.mubr.msk.bf16.mxu1 %vm3504_vm0, %v4655_v0 }
  0x34   :  { %3170 = vmatpush3.bf16.msra.mxu0 %v3399_v5  ;;  %3286 = vmatpush3.bf16.msra.mxu1 %v3399_v5  ;;  %v3457_v5 = vld [vmem:[%s4652_s0 + $0x198] sm:$0xff]  }
  0x35   :  { %3171 = vmatprep.subr.bf16.mxu0 %v4655_v0  ;;  %3287 = vmatprep.subr.bf16.mxu1 %v4655_v0 }
  0x38   :  { %3172 = vmatpush3.bf16.msra.mxu0 %v3400_v6  ;;  %3288 = vmatpush3.bf16.msra.mxu1 %v3400_v6  ;;  %v3458_v6 = vld [vmem:[%s4652_s0 + $0x25c] sm:$0xff]  }
  0x39   :  { %3173 = vmatprep.subr.bf16.mxu0 %v4655_v0  ;;  %3289 = vmatprep.subr.bf16.mxu1 %v4655_v0 }
  0x3a   :  { %2958 = vmatmul.mubr.bf16.gmra.mrb[12].mxu0 %v3409_v15  ;;  %3074 = vmatmul.mubr.bf16.gmra.mrb[12].mxu1 %v3410_v16 }
  0x3b   :  { %2961 = vmatprep.mubr.msk.bf16.mxu0 %vm3504_vm0, %v4655_v0  ;;  %3077 = vmatprep.mubr.msk.bf16.mxu1 %vm3504_vm0, %v4655_v0 }
  0x3c   :  { %3174 = vmatpush3.bf16.msra.mxu0 %v3401_v7  ;;  %3290 = vmatpush3.bf16.msra.mxu1 %v3401_v7 }
  0x3d   :  { %3175 = vmatprep.subr.bf16.mxu0 %v4655_v0  ;;  %3291 = vmatprep.subr.bf16.mxu1 %v4655_v0 }
  0x40   :  { %3176 = vmatpush3.bf16.msra.mxu0 %v3402_v8  ;;  %3292 = vmatpush3.bf16.msra.mxu1 %v3402_v8 }
  0x42   :  { %2962 = vmatmul.mubr.bf16.gmra.mrb[16].mxu0 %v3411_v17  ;;  %3078 = vmatmul.mubr.bf16.gmra.mrb[16].mxu1 %v3412_v18  ;;  %v3459_v17 = vld [vmem:[%s4652_s0 + $0x1a0] sm:$0xff]  }
  0x43   :  { %2965 = vmatprep.mubr.msk.bf16.mxu0 %vm3504_vm0, %v4655_v0  ;;  %3081 = vmatprep.mubr.msk.bf16.mxu1 %vm3504_vm0, %v4655_v0  ;;  %v3460_v18 = vld [vmem:[%s4652_s0 + $0x264] sm:$0xff]  }
  0x4a   :  { %2966 = vmatmul.mubr.bf16.gmra.mrb[20].mxu0 %v3413_v19  ;;  %3082 = vmatmul.mubr.bf16.gmra.mrb[20].mxu1 %v3414_v20 }
  0x4b   :  { %2969 = vmatprep.mubr.msk.bf16.mxu0 %vm3504_vm0, %v4655_v0  ;;  %3085 = vmatprep.mubr.msk.bf16.mxu1 %vm3504_vm0, %v4655_v0 }
  0x52   :  { %2970 = vmatmul.mubr.bf16.gmra.mrb[24].mxu0 %v3415_v21  ;;  %3086 = vmatmul.mubr.bf16.gmra.mrb[24].mxu1 %v3416_v22 }
  0x53   :  { %2973 = vmatprep.mubr.msk.bf16.mxu0 %vm3504_vm0, %v4655_v0  ;;  %3089 = vmatprep.mubr.msk.bf16.mxu1 %vm3504_vm0, %v4655_v0 }
  0x5a   :  { %2974 = vmatmul.mubr.bf16.gmra.mrb[28].mxu0 %v3417_v23  ;;  %3090 = vmatmul.mubr.bf16.gmra.mrb[28].mxu1 %v3418_v24 }
  0x5b   :  { %2977 = vmatprep.mubr.msk.bf16.mxu0 %vm3504_vm0, %v4655_v0  ;;  %3093 = vmatprep.mubr.msk.bf16.mxu1 %vm3504_vm0, %v4655_v0 }
  0x62   :  { %2978 = vmatmul.mubr.bf16.gmra.mrb[32].mxu0 %v3419_v25  ;;  %3094 = vmatmul.mubr.bf16.gmra.mrb[32].mxu1 %v3420_v26 }
  0x63   :  { %2981 = vmatprep.mubr.msk.bf16.mxu0 %vm3504_vm0, %v4655_v0  ;;  %3097 = vmatprep.mubr.msk.bf16.mxu1 %vm3504_vm0, %v4655_v0 }
  0x6a   :  { %2982 = vmatmul.mubr.bf16.gmra.mrb[36].mxu0 %v3421_v27  ;;  %3098 = vmatmul.mubr.bf16.gmra.mrb[36].mxu1 %v3422_v28 }
  0x6b   :  { %2985 = vmatprep.mubr.msk.bf16.mxu0 %vm3504_vm0, %v4655_v0  ;;  %3101 = vmatprep.mubr.msk.bf16.mxu1 %vm3504_vm0, %v4655_v0 }
  0x72   :  { %2986 = vmatmul.mubr.bf16.gmra.mrb[40].mxu0 %v3423_v29  ;;  %3102 = vmatmul.mubr.bf16.gmra.mrb[40].mxu1 %v3424_v30  ;;  %v3461_v29 = vld [vmem:[%s4652_s0 + $0x1a8] sm:$0xff]  }
  0x73   :  { %2989 = vmatprep.mubr.msk.bf16.mxu0 %vm3504_vm0, %v4655_v0  ;;  %3105 = vmatprep.mubr.msk.bf16.mxu1 %vm3504_vm0, %v4655_v0  ;;  %v3462_v30 = vld [vmem:[%s4652_s0 + $0x26c] sm:$0xff]  }
  0x7a   :  { %2990 = vmatmul.mubr.bf16.gmra.mrb[44].mxu0 %v3425_v31  ;;  %3106 = vmatmul.mubr.bf16.gmra.mrb[44].mxu1 %v3426_v32 }
  0x7b   :  { %2993 = vmatprep.mubr.msk.bf16.mxu0 %vm3504_vm0, %v4655_v0  ;;  %3109 = vmatprep.mubr.msk.bf16.mxu1 %vm3504_vm0, %v4655_v0 }
  0x82   :  { %2994 = vmatmul.mubr.bf16.gmra.mrb[48].mxu0 %v3427_v33  ;;  %3110 = vmatmul.mubr.bf16.gmra.mrb[48].mxu1 %v3428_v34 }
  0x83   :  { %2997 = vmatprep.mubr.msk.bf16.mxu0 %vm3504_vm0, %v4655_v0  ;;  %3113 = vmatprep.mubr.msk.bf16.mxu1 %vm3504_vm0, %v4655_v0 }
  0x8a   :  { %2998 = vmatmul.mubr.bf16.gmra.mrb[52].mxu0 %v3429_v35  ;;  %3114 = vmatmul.mubr.bf16.gmra.mrb[52].mxu1 %v3430_v36 }
  0x8b   :  { %3001 = vmatprep.mubr.msk.bf16.mxu0 %vm3504_vm0, %v4655_v0  ;;  %3117 = vmatprep.mubr.msk.bf16.mxu1 %vm3504_vm0, %v4655_v0 }
  0x92   :  { %3002 = vmatmul.mubr.bf16.gmra.mrb[56].mxu0 %v3431_v37  ;;  %3118 = vmatmul.mubr.bf16.gmra.mrb[56].mxu1 %v3432_v38 }
  0x93   :  { %3005 = vmatprep.mubr.msk.bf16.mxu0 %vm3504_vm0, %v4655_v0  ;;  %3121 = vmatprep.mubr.msk.bf16.mxu1 %vm3504_vm0, %v4655_v0 }
  0x9a   :  { %3006 = vmatmul.mubr.bf16.gmra.mrb[60].mxu0 %v3433_v39  ;;  %3122 = vmatmul.mubr.bf16.gmra.mrb[60].mxu1 %v3434_v40 }
  0x9b   :  { %3009 = vmatprep.mubr.msk.bf16.mxu0 %vm3504_vm0, %v4655_v0  ;;  %3125 = vmatprep.mubr.msk.bf16.mxu1 %vm3504_vm0, %v4655_v0 }
  0xa2   :  { %3010 = vmatmul.mubr.bf16.gmra.mrb[64].mxu0 %v3435_v41  ;;  %3126 = vmatmul.mubr.bf16.gmra.mrb[64].mxu1 %v3436_v42  ;;  %v3463_v41 = vld [vmem:[%s4652_s0 + $0x1b0] sm:$0xff]  }
  0xa3   :  { %3013 = vmatprep.mubr.msk.bf16.mxu0 %vm3504_vm0, %v4655_v0  ;;  %3129 = vmatprep.mubr.msk.bf16.mxu1 %vm3504_vm0, %v4655_v0  ;;  %v3464_v42 = vld [vmem:[%s4652_s0 + $0x274] sm:$0xff]  }
  0xaa   :  { %3014 = vmatmul.mubr.bf16.gmra.mrb[68].mxu0 %v3437_v43  ;;  %3130 = vmatmul.mubr.bf16.gmra.mrb[68].mxu1 %v3438_v44 }
  0xab   :  { %3017 = vmatprep.mubr.msk.bf16.mxu0 %vm3504_vm0, %v4655_v0  ;;  %3133 = vmatprep.mubr.msk.bf16.mxu1 %vm3504_vm0, %v4655_v0 }
  0xb2   :  { %3018 = vmatmul.mubr.bf16.gmra.mrb[72].mxu0 %v3439_v45  ;;  %3134 = vmatmul.mubr.bf16.gmra.mrb[72].mxu1 %v3440_v46 }
  0xb3   :  { %3021 = vmatprep.mubr.msk.bf16.mxu0 %vm3504_vm0, %v4655_v0  ;;  %3137 = vmatprep.mubr.msk.bf16.mxu1 %vm3504_vm0, %v4655_v0 }
  0xba   :  { %3022 = vmatmul.mubr.bf16.gmra.mrb[76].mxu0 %v3441_v47  ;;  %3138 = vmatmul.mubr.bf16.gmra.mrb[76].mxu1 %v3442_v48 }
  0xbb   :  { %3025 = vmatprep.mubr.msk.bf16.mxu0 %vm3504_vm0, %v4655_v0  ;;  %3141 = vmatprep.mubr.msk.bf16.mxu1 %vm3504_vm0, %v4655_v0 }
  0xc2   :  { %3026 = vmatmul.mubr.bf16.gmra.mrb[80].mxu0 %v3443_v49  ;;  %3142 = vmatmul.mubr.bf16.gmra.mrb[80].mxu1 %v3444_v50 }
  0xc3   :  { %3029 = vmatprep.mubr.msk.bf16.mxu0 %vm3504_vm0, %v4655_v0  ;;  %3145 = vmatprep.mubr.msk.bf16.mxu1 %vm3504_vm0, %v4655_v0 }
  0xca   :  { %3030 = vmatmul.mubr.bf16.gmra.mrb[84].mxu0 %v3445_v51  ;;  %3146 = vmatmul.mubr.bf16.gmra.mrb[84].mxu1 %v3446_v52 }
  0xcb   :  { %3033 = vmatprep.mubr.msk.bf16.mxu0 %vm3504_vm0, %v4655_v0  ;;  %3149 = vmatprep.mubr.msk.bf16.mxu1 %vm3504_vm0, %v4655_v0 }
  0xd2   :  { %3034 = vmatmul.mubr.bf16.gmra.mrb[88].mxu0 %v3447_v53  ;;  %3150 = vmatmul.mubr.bf16.gmra.mrb[88].mxu1 %v3448_v54  ;;  %v3465_v53 = vld [vmem:[%s4652_s0 + $0x1b8] sm:$0xff]  }
  0xd3   :  { %3037 = vmatprep.mubr.msk.bf16.mxu0 %vm3504_vm0, %v4655_v0  ;;  %3153 = vmatprep.mubr.msk.bf16.mxu1 %vm3504_vm0, %v4655_v0  ;;  %v3466_v54 = vld [vmem:[%s4652_s0 + $0x27c] sm:$0xff]  }
  0xda   :  { %3038 = vmatmul.mubr.bf16.gmra.mrb[92].mxu0 %v3449_v55  ;;  %3154 = vmatmul.mubr.bf16.gmra.mrb[92].mxu1 %v3450_v56 }
  0xdb   :  { %3041 = vmatprep.mubr.msk.bf16.mxu0 %vm3504_vm0, %v4655_v0  ;;  %3157 = vmatprep.mubr.msk.bf16.mxu1 %vm3504_vm0, %v4655_v0 }
  0xe2   :  { %3042 = vmatmul.mubr.bf16.gmra.mrb[96].mxu0 %v3451_v57  ;;  %3158 = vmatmul.mubr.bf16.gmra.mrb[96].mxu1 %v3452_v58 }
  0xe3   :  { %3177 = vmatprep.mubr.msk.bf16.mxu0 %vm3504_vm0, %v4655_v0  ;;  %3293 = vmatprep.mubr.msk.bf16.mxu1 %vm3504_vm0, %v4655_v0 }
  0xea   :  { %3178 = vmatmul.mubr.bf16.vlgmr.msra.gmra.mrb[100].mxu0 %v3453_v59  ;;  %3294 = vmatmul.mubr.bf16.vlgmr.msra.gmra.mrb[100].mxu1 %v3454_v60 }
  0xeb   :  { %3181 = vmatprep.mubr.msk.bf16.mxu0 %vm3504_vm0, %v4655_v0  ;;  %3297 = vmatprep.mubr.msk.bf16.mxu1 %vm3504_vm0, %v4655_v0 }
  0xf2   :  { %3182 = vmatmul.mubr.bf16.gmra.mrb[104].mxu0 %v3455_v61  ;;  %3298 = vmatmul.mubr.bf16.gmra.mrb[104].mxu1 %v3456_v62 }
  0xf3   :  { %3185 = vmatprep.mubr.msk.bf16.mxu0 %vm3504_vm0, %v4655_v0  ;;  %3301 = vmatprep.mubr.msk.bf16.mxu1 %vm3504_vm0, %v4655_v0 }
  0xf5   :  { %v3855_v63 = vpop.f32.mrb[0].mxu0  ;;  %v3857_v1 = vpop.f32.mrb[0].mxu1 }
  0xf6   :  { %v2947_v3 = vpop.f32.mrb[1].mxu0  ;;  %v3063_v4 = vpop.f32.mrb[1].mxu1 }
  0xf7   :  { %v3867_v7 = vpop.f32.mrb[2].mxu0  ;;  %v3869_v8 = vpop.f32.mrb[2].mxu1 }
  0xf8   :  { %v2948_v10 = vpop.f32.mrb[3].mxu0  ;;  %v3064_v11 = vpop.f32.mrb[3].mxu1 }
  0xfa   :  { %3186 = vmatmul.mubr.bf16.gmra.mrb[108].mxu0 %v3457_v5  ;;  %3302 = vmatmul.mubr.bf16.gmra.mrb[108].mxu1 %v3458_v6  ;;  %v3467_v5 = vld [vmem:[%s4652_s0 + $0x1c0] sm:$0xff]  }
  0xfb   :  { %3189 = vmatprep.mubr.msk.bf16.mxu0 %vm3504_vm0, %v4655_v0  ;;  %3305 = vmatprep.mubr.msk.bf16.mxu1 %vm3504_vm0, %v4655_v0  ;;  %v3468_v6 = vld [vmem:[%s4652_s0 + $0x284] sm:$0xff]  }
  0xfd   :  { %v3877_v12 = vpop.f32.mrb[4].mxu0  ;;  %v3879_v13 = vpop.f32.mrb[4].mxu1 }
  0xfe   :  { %v2951_v15 = vpop.f32.mrb[5].mxu0  ;;  %v3067_v16 = vpop.f32.mrb[5].mxu1 }
  0xff   :  { %v3889_v19 = vpop.f32.mrb[6].mxu0  ;;  %v3891_v20 = vpop.f32.mrb[6].mxu1 }
 0x100   :  { %v2952_v22 = vpop.f32.mrb[7].mxu0  ;;  %v3068_v23 = vpop.f32.mrb[7].mxu1 }
 0x102   :  { %3190 = vmatmul.mubr.bf16.gmra.mrb[112].mxu0 %v3459_v17  ;;  %3306 = vmatmul.mubr.bf16.gmra.mrb[112].mxu1 %v3460_v18 }
 0x103   :  { %3193 = vmatprep.mubr.msk.bf16.mxu0 %vm3504_vm0, %v4655_v0  ;;  %3309 = vmatprep.mubr.msk.bf16.mxu1 %vm3504_vm0, %v4655_v0 }
 0x105   :  { %v3899_v24 = vpop.f32.mrb[8].mxu0  ;;  %v3901_v25 = vpop.f32.mrb[8].mxu1 }
 0x106   :  { %v2955_v27 = vpop.f32.mrb[9].mxu0  ;;  %v3071_v28 = vpop.f32.mrb[9].mxu1 }
 0x107   :  { %v3911_v31 = vpop.f32.mrb[10].mxu0  ;;  %v3913_v32 = vpop.f32.mrb[10].mxu1 }
 0x108   :  { %v2956_v34 = vpop.f32.mrb[11].mxu0  ;;  %v3072_v35 = vpop.f32.mrb[11].mxu1 }
 0x10a   :  { %3194 = vmatmul.mubr.bf16.gmra.mrb[116].mxu0 %v3461_v29  ;;  %3310 = vmatmul.mubr.bf16.gmra.mrb[116].mxu1 %v3462_v30  ;;  %v3469_v29 = vld [vmem:[%s4652_s0 + $0x1c8] sm:$0xff]  }
 0x10b   :  { %3197 = vmatprep.mubr.msk.bf16.mxu0 %vm3504_vm0, %v4655_v0  ;;  %3313 = vmatprep.mubr.msk.bf16.mxu1 %vm3504_vm0, %v4655_v0  ;;  %v3470_v30 = vld [vmem:[%s4652_s0 + $0x28c] sm:$0xff]  }
 0x10d   :  { %v3921_v36 = vpop.f32.mrb[12].mxu0  ;;  %v3923_v37 = vpop.f32.mrb[12].mxu1 }
 0x10e   :  { %v2959_v39 = vpop.f32.mrb[13].mxu0  ;;  %v3075_v40 = vpop.f32.mrb[13].mxu1 }
 0x10f   :  { %v3933_v43 = vpop.f32.mrb[14].mxu0  ;;  %v3935_v44 = vpop.f32.mrb[14].mxu1 }
 0x110   :  { %v2960_v46 = vpop.f32.mrb[15].mxu0  ;;  %v3076_v47 = vpop.f32.mrb[15].mxu1 }
 0x112   :  { %3198 = vmatmul.mubr.bf16.gmra.mrb[120].mxu0 %v3463_v41  ;;  %3314 = vmatmul.mubr.bf16.gmra.mrb[120].mxu1 %v3464_v42 }
 0x113   :  { %3201 = vmatprep.mubr.msk.bf16.mxu0 %vm3504_vm0, %v4655_v0  ;;  %3317 = vmatprep.mubr.msk.bf16.mxu1 %vm3504_vm0, %v4655_v0 }
 0x115   :  { %v3943_v48 = vpop.f32.mrb[16].mxu0  ;;  %v3945_v49 = vpop.f32.mrb[16].mxu1 }
 0x116   :  { %v2963_v51 = vpop.f32.mrb[17].mxu0  ;;  %v3079_v52 = vpop.f32.mrb[17].mxu1 }
 0x117   :  { %v3955_v55 = vpop.f32.mrb[18].mxu0  ;;  %v3957_v56 = vpop.f32.mrb[18].mxu1 }
 0x118   :  { %v2964_v58 = vpop.f32.mrb[19].mxu0  ;;  %v3080_v59 = vpop.f32.mrb[19].mxu1 }
 0x11a   :  { %3202 = vmatmul.mubr.bf16.gmra.mrb[124].mxu0 %v3465_v53  ;;  %3318 = vmatmul.mubr.bf16.gmra.mrb[124].mxu1 %v3466_v54  ;;  %v3471_v53 = vld [vmem:[%s4652_s0 + $0x1d0] sm:$0xff]  }
 0x11b   :  { %3205 = vmatprep.mubr.msk.bf16.mxu0 %vm3504_vm0, %v4655_v0  ;;  %3321 = vmatprep.mubr.msk.bf16.mxu1 %vm3504_vm0, %v4655_v0  ;;  %v3472_v54 = vld [vmem:[%s4652_s0 + $0x294] sm:$0xff]  }
 0x11d   :  { %v3965_v60 = vpop.f32.mrb[20].mxu0  ;;  %v3967_v61 = vpop.f32.mrb[20].mxu1 }
 0x11e   :  { %v2967_v3 = vpop.f32.mrb[21].mxu0  ;;  %v3083_v4 = vpop.f32.mrb[21].mxu1 }
 0x11f   :  { %v3977_v10 = vpop.f32.mrb[22].mxu0  ;;  %v3979_v11 = vpop.f32.mrb[22].mxu1 }
 0x120   :  { %v2968_v16 = vpop.f32.mrb[23].mxu0  ;;  %v3084_v17 = vpop.f32.mrb[23].mxu1 }
 0x122   :  { %3206 = vmatmul.mubr.bf16.gmra.mrb[128].mxu0 %v3467_v5  ;;  %3322 = vmatmul.mubr.bf16.gmra.mrb[128].mxu1 %v3468_v6 }
 0x123   :  { %3209 = vmatprep.mubr.msk.bf16.mxu0 %vm3504_vm0, %v4655_v0  ;;  %3325 = vmatprep.mubr.msk.bf16.mxu1 %vm3504_vm0, %v4655_v0 }
 0x125   :  { %v3987_v18 = vpop.f32.mrb[24].mxu0  ;;  %v3989_v22 = vpop.f32.mrb[24].mxu1 }
 0x126   :  { %v2971_v27 = vpop.f32.mrb[25].mxu0  ;;  %v3087_v28 = vpop.f32.mrb[25].mxu1 }
 0x127   :  { %v3999_v34 = vpop.f32.mrb[26].mxu0  ;;  %v4001_v35 = vpop.f32.mrb[26].mxu1 }
 0x128   :  { %v2972_v40 = vpop.f32.mrb[27].mxu0  ;;  %v3088_v41 = vpop.f32.mrb[27].mxu1 }
 0x12a   :  { %3210 = vmatmul.mubr.bf16.gmra.mrb[132].mxu0 %v3469_v29  ;;  %3326 = vmatmul.mubr.bf16.gmra.mrb[132].mxu1 %v3470_v30  ;;  %v3473_v29 = vld [vmem:[%s4652_s0 + $0x1d8] sm:$0xff]  }
 0x12b   :  { %3213 = vmatprep.mubr.msk.bf16.mxu0 %vm3504_vm0, %v4655_v0  ;;  %3329 = vmatprep.mubr.msk.bf16.mxu1 %vm3504_vm0, %v4655_v0  ;;  %v3474_v30 = vld [vmem:[%s4652_s0 + $0x29c] sm:$0xff]  }
 0x12d   :  { %v4009_v42 = vpop.f32.mrb[28].mxu0  ;;  %v4011_v46 = vpop.f32.mrb[28].mxu1 }
 0x12e   :  { %v2975_v51 = vpop.f32.mrb[29].mxu0  ;;  %v3091_v52 = vpop.f32.mrb[29].mxu1 }
 0x12f   :  { %v4021_v58 = vpop.f32.mrb[30].mxu0  ;;  %v4023_v59 = vpop.f32.mrb[30].mxu1 }
 0x130   :  { %v2976_v4 = vpop.f32.mrb[31].mxu0  ;;  %v3092_v5 = vpop.f32.mrb[31].mxu1 }
 0x132   :  { %3214 = vmatmul.mubr.bf16.gmra.mrb[136].mxu0 %v3471_v53  ;;  %3330 = vmatmul.mubr.bf16.gmra.mrb[136].mxu1 %v3472_v54 }
 0x133   :  { %3217 = vmatprep.mubr.msk.bf16.mxu0 %vm3504_vm0, %v4655_v0  ;;  %3333 = vmatprep.mubr.msk.bf16.mxu1 %vm3504_vm0, %v4655_v0 }
 0x135   :  { %v4031_v6 = vpop.f32.mrb[32].mxu0  ;;  %v4033_v16 = vpop.f32.mrb[32].mxu1 }
 0x136   :  { %v2979_v27 = vpop.f32.mrb[33].mxu0  ;;  %v3095_v28 = vpop.f32.mrb[33].mxu1 }
 0x137   :  { %v4043_v40 = vpop.f32.mrb[34].mxu0  ;;  %v4045_v41 = vpop.f32.mrb[34].mxu1 }
 0x138   :  { %v2980_v52 = vpop.f32.mrb[35].mxu0  ;;  %v3096_v53 = vpop.f32.mrb[35].mxu1 }
 0x13a   :  { %3218 = vmatmul.mubr.bf16.gmra.mrb[140].mxu0 %v3473_v29  ;;  %3334 = vmatmul.mubr.bf16.gmra.mrb[140].mxu1 %v3474_v30  ;;  %v3475_v29 = vld [vmem:[%s4652_s0 + $0x1e0] sm:$0xff]  }
 0x13b   :  { %3221 = vmatprep.mubr.msk.bf16.mxu0 %vm3504_vm0, %v4655_v0  ;;  %3337 = vmatprep.mubr.msk.bf16.mxu1 %vm3504_vm0, %v4655_v0  ;;  %v3476_v30 = vld [vmem:[%s4652_s0 + $0x2a4] sm:$0xff]  }
 0x13d   :  { %v4053_v54 = vpop.f32.mrb[36].mxu0  ;;  %v4055_v4 = vpop.f32.mrb[36].mxu1 }
 0x13e   :  { %v2983_v27 = vpop.f32.mrb[37].mxu0  ;;  %v3099_v28 = vpop.f32.mrb[37].mxu1 }
 0x13f   :  { %v4065_v52 = vpop.f32.mrb[38].mxu0  ;;  %v4067_v53 = vpop.f32.mrb[38].mxu1 }
 0x140   :  { %v2984_v17 = vpop.f32.mrb[39].mxu0  ;;  %v3100_v3 = vpop.f32.mrb[39].mxu1 }
 0x141   :  { %v3477_v3 = vld [vmem:[%s4652_s0 + $0x1e8] sm:$0xff]  }
 0x142   :  { %3222 = vmatmul.mubr.bf16.gmra.mrb[144].mxu0 %v3475_v29  ;;  %3338 = vmatmul.mubr.bf16.gmra.mrb[144].mxu1 %v3476_v30  ;;  %v3478_v17 = vld [vmem:[%s4652_s0 + $0x2ac] sm:$0xff]  }
 0x143   :  { %3225 = vmatprep.mubr.msk.bf16.mxu0 %vm3504_vm0, %v4655_v0  ;;  %3341 = vmatprep.mubr.msk.bf16.mxu1 %vm3504_vm0, %v4655_v0 }
 0x145   :  { %v4075_v27 = vpop.f32.mrb[40].mxu0  ;;  %v4077_v28 = vpop.f32.mrb[40].mxu1 }
 0x146   :  { %v2987_v47 = vpop.f32.mrb[41].mxu0  ;;  %v3103_v39 = vpop.f32.mrb[41].mxu1 }
 0x147   :  { %v4087_v29 = vpop.f32.mrb[42].mxu0  ;;  %v4089_v30 = vpop.f32.mrb[42].mxu1 }
 0x148   :  { %v2988_v23 = vpop.f32.mrb[43].mxu0  ;;  %v3104_v15 = vpop.f32.mrb[43].mxu1 }
 0x149   :  { %v3479_v15 = vld [vmem:[%s4652_s0 + $0x1f0] sm:$0xff]  }
 0x14a   :  { %3226 = vmatmul.mubr.bf16.gmra.mrb[148].mxu0 %v3477_v3  ;;  %3342 = vmatmul.mubr.bf16.gmra.mrb[148].mxu1 %v3478_v17  ;;  %v3480_v23 = vld [vmem:[%s4652_s0 + $0x2b4] sm:$0xff]  }
 0x14b   :  { %3229 = vmatprep.mubr.msk.bf16.mxu0 %vm3504_vm0, %v4655_v0  ;;  %3345 = vmatprep.mubr.msk.bf16.mxu1 %vm3504_vm0, %v4655_v0 }
 0x14d   :  { %v4097_v39 = vpop.f32.mrb[44].mxu0  ;;  %v4099_v47 = vpop.f32.mrb[44].mxu1 }
 0x14e   :  { %v2991_v62 = vpop.f32.mrb[45].mxu0  ;;  %v3107_v57 = vpop.f32.mrb[45].mxu1 }
 0x14f   :  { %v4109_v3 = vpop.f32.mrb[46].mxu0  ;;  %v4111_v17 = vpop.f32.mrb[46].mxu1 }
 0x150   :  { %4709 = vst [vmem:[#allocation2_spill] sm:$0xff] %v4109_v3  ;;  %4710 = vst [vmem:[#allocation3_spill] sm:$0xff] %v4111_v17  ;;  %v2992_v50 = vpop.f32.mrb[47].mxu0  ;;  %v3108_v45 = vpop.f32.mrb[47].mxu1 }
 0x151   :  { %v3481_v45 = vld [vmem:[%s4652_s0 + $0x1f8] sm:$0xff]  }
 0x152   :  { %3230 = vmatmul.mubr.bf16.gmra.mrb[152].mxu0 %v3479_v15  ;;  %3346 = vmatmul.mubr.bf16.gmra.mrb[152].mxu1 %v3480_v23  ;;  %v3482_v50 = vld [vmem:[%s4652_s0 + $0x2bc] sm:$0xff]  }
 0x153   :  { %3233 = vmatprep.mubr.msk.bf16.mxu0 %vm3504_vm0, %v4655_v0  ;;  %3349 = vmatprep.mubr.msk.bf16.mxu1 %vm3504_vm0, %v4655_v0 }
 0x155   :  { %v4119_v57 = vpop.f32.mrb[48].mxu0  ;;  %v4121_v62 = vpop.f32.mrb[48].mxu1 }
 0x156   :  { %4711 = vst [vmem:[#allocation4_spill] sm:$0xff] %v4119_v57  ;;  %4712 = vst [vmem:[#allocation5_spill] sm:$0xff] %v4121_v62  ;;  %v2995_v38 = vpop.f32.mrb[49].mxu0  ;;  %v3111_v33 = vpop.f32.mrb[49].mxu1 }
 0x157   :  { %v4131_v15 = vpop.f32.mrb[50].mxu0  ;;  %v4133_v23 = vpop.f32.mrb[50].mxu1 }
 0x158   :  { %4713 = vst [vmem:[#allocation6_spill] sm:$0xff] %v4131_v15  ;;  %4714 = vst [vmem:[#allocation7_spill] sm:$0xff] %v4133_v23  ;;  %v2996_v26 = vpop.f32.mrb[51].mxu0  ;;  %v3112_v21 = vpop.f32.mrb[51].mxu1 }
 0x159   :  { %v3483_v21 = vld [vmem:[%s4652_s0 + $0x200] sm:$0xff]  }
 0x15a   :  { %3234 = vmatmul.mubr.bf16.gmra.mrb[156].mxu0 %v3481_v45  ;;  %3350 = vmatmul.mubr.bf16.gmra.mrb[156].mxu1 %v3482_v50  ;;  %v3484_v26 = vld [vmem:[%s4652_s0 + $0x2c4] sm:$0xff]  }
 0x15b   :  { %3237 = vmatprep.mubr.msk.bf16.mxu0 %vm3504_vm0, %v4655_v0  ;;  %3353 = vmatprep.mubr.msk.bf16.mxu1 %vm3504_vm0, %v4655_v0 }
 0x15d   :  { %v4141_v33 = vpop.f32.mrb[52].mxu0  ;;  %v4143_v38 = vpop.f32.mrb[52].mxu1 }
 0x15e   :  { %4715 = vst [vmem:[#allocation8_spill] sm:$0xff] %v4141_v33  ;;  %4716 = vst [vmem:[#allocation9_spill] sm:$0xff] %v4143_v38  ;;  %v2999_v14 = vpop.f32.mrb[53].mxu0  ;;  %v3115_v9 = vpop.f32.mrb[53].mxu1 }
 0x15f   :  { %v4153_v45 = vpop.f32.mrb[54].mxu0  ;;  %v4155_v50 = vpop.f32.mrb[54].mxu1  ;;  %v4719_v9 = vmov 0.0  }
 0x160   :  { %4717 = vst [vmem:[#allocation10_spill] sm:$0xff] %v4153_v45  ;;  %4718 = vst [vmem:[#allocation11_spill] sm:$0xff] %v4155_v50  ;;  %v3000_v2 = vpop.f32.mrb[55].mxu0  ;;  %v3116_v0 = vpop.f32.mrb[55].mxu1 }
 0x161   :  { %v3485_v0 = vld [vmem:[%s4652_s0 + $0x208] sm:$0xff]  }
 0x162   :  { %3238 = vmatmul.mubr.bf16.gmra.mrb[160].mxu0 %v3483_v21  ;;  %3354 = vmatmul.mubr.bf16.gmra.mrb[160].mxu1 %v3484_v26  ;;  %v3486_v2 = vld [vmem:[%s4652_s0 + $0x2cc] sm:$0xff]  }
 0x163   :  { %3241 = vmatprep.mubr.msk.bf16.mxu0 %vm3504_vm0, %v4719_v9  ;;  %3357 = vmatprep.mubr.msk.bf16.mxu1 %vm3504_vm0, %v4719_v9 }
 0x165   :  { %v4163_v14 = vpop.f32.mrb[56].mxu0  ;;  %v4165_v5 = vpop.f32.mrb[56].mxu1 }
 0x166   :  { %4720 = vst [vmem:[#allocation12_spill] sm:$0xff] %v4163_v14  ;;  %4721 = vst [vmem:[#allocation13_spill] sm:$0xff] %v4165_v5  ;;  %v3003_v33 = vpop.f32.mrb[57].mxu0  ;;  %v3119_v23 = vpop.f32.mrb[57].mxu1 }
 0x167   :  { %v4175_v21 = vpop.f32.mrb[58].mxu0  ;;  %v4177_v26 = vpop.f32.mrb[58].mxu1 }
 0x168   :  { %4722 = vst [vmem:[#allocation14_spill] sm:$0xff] %v4175_v21  ;;  %4723 = vst [vmem:[#allocation15_spill] sm:$0xff] %v4177_v26  ;;  %v3004_v50 = vpop.f32.mrb[59].mxu0  ;;  %v3120_v45 = vpop.f32.mrb[59].mxu1 }
 0x169   :  { %v3487_v45 = vld [vmem:[%s4652_s0 + $0x210] sm:$0xff]  }
 0x16a   :  { %3242 = vmatmul.mubr.bf16.gmra.mrb[164].mxu0 %v3485_v0  ;;  %3358 = vmatmul.mubr.bf16.gmra.mrb[164].mxu1 %v3486_v2  ;;  %v3488_v50 = vld [vmem:[%s4652_s0 + $0x2d4] sm:$0xff]  }
 0x16b   :  { %3245 = vmatprep.mubr.msk.bf16.mxu0 %vm3504_vm0, %v4719_v9  ;;  %3361 = vmatprep.mubr.msk.bf16.mxu1 %vm3504_vm0, %v4719_v9 }
 0x16d   :  { %v4185_v23 = vpop.f32.mrb[60].mxu0  ;;  %v4187_v33 = vpop.f32.mrb[60].mxu1 }
 0x16e   :  { %4724 = vst [vmem:[#allocation16_spill] sm:$0xff] %v4185_v23  ;;  %4725 = vst [vmem:[#allocation17_spill] sm:$0xff] %v4187_v33  ;;  %v3007_v5 = vpop.f32.mrb[61].mxu0  ;;  %v3123_v14 = vpop.f32.mrb[61].mxu1 }
 0x16f   :  { %v4197_v0 = vpop.f32.mrb[62].mxu0  ;;  %v4199_v2 = vpop.f32.mrb[62].mxu1 }
 0x170   :  { %4726 = vst [vmem:[#allocation18_spill] sm:$0xff] %v4197_v0  ;;  %4727 = vst [vmem:[#allocation19_spill] sm:$0xff] %v4199_v2  ;;  %v3008_v26 = vpop.f32.mrb[63].mxu0  ;;  %v3124_v21 = vpop.f32.mrb[63].mxu1 }
 0x171   :  { %v3489_v21 = vld [vmem:[%s4652_s0 + $0x218] sm:$0xff]  }
 0x172   :  { %3246 = vmatmul.mubr.bf16.gmra.mrb[168].mxu0 %v3487_v45  ;;  %3362 = vmatmul.mubr.bf16.gmra.mrb[168].mxu1 %v3488_v50  ;;  %v3490_v26 = vld [vmem:[%s4652_s0 + $0x2dc] sm:$0xff]  }
 0x173   :  { %3249 = vmatprep.mubr.msk.bf16.mxu0 %vm3504_vm0, %v4719_v9  ;;  %3365 = vmatprep.mubr.msk.bf16.mxu1 %vm3504_vm0, %v4719_v9 }
 0x175   :  { %v4207_v5 = vpop.f32.mrb[64].mxu0  ;;  %v4209_v14 = vpop.f32.mrb[64].mxu1 }
 0x176   :  { %4728 = vst [vmem:[#allocation20_spill] sm:$0xff] %v4207_v5  ;;  %4729 = vst [vmem:[#allocation21_spill] sm:$0xff] %v4209_v14  ;;  %v3011_v33 = vpop.f32.mrb[65].mxu0  ;;  %v3127_v23 = vpop.f32.mrb[65].mxu1 }
 0x177   :  { %v4219_v45 = vpop.f32.mrb[66].mxu0  ;;  %v4221_v50 = vpop.f32.mrb[66].mxu1 }
 0x178   :  { %4730 = vst [vmem:[#allocation22_spill] sm:$0xff] %v4219_v45  ;;  %4731 = vst [vmem:[#allocation23_spill] sm:$0xff] %v4221_v50  ;;  %v3012_v2 = vpop.f32.mrb[67].mxu0  ;;  %v3128_v0 = vpop.f32.mrb[67].mxu1 }
 0x179   :  { %v3491_v0 = vld [vmem:[%s4652_s0 + $0x220] sm:$0xff]  }
 0x17a   :  { %3250 = vmatmul.mubr.bf16.gmra.mrb[172].mxu0 %v3489_v21  ;;  %3366 = vmatmul.mubr.bf16.gmra.mrb[172].mxu1 %v3490_v26  ;;  %v3492_v2 = vld [vmem:[%s4652_s0 + $0x2e4] sm:$0xff]  }
 0x17b   :  { %3253 = vmatprep.mubr.msk.bf16.mxu0 %vm3504_vm0, %v4719_v9  ;;  %3369 = vmatprep.mubr.msk.bf16.mxu1 %vm3504_vm0, %v4719_v9 }
 0x17d   :  { %v4229_v23 = vpop.f32.mrb[68].mxu0  ;;  %v4231_v33 = vpop.f32.mrb[68].mxu1 }
 0x17e   :  { %4732 = vst [vmem:[#allocation24_spill] sm:$0xff] %v4229_v23  ;;  %4733 = vst [vmem:[#allocation25_spill] sm:$0xff] %v4231_v33  ;;  %v3015_v14 = vpop.f32.mrb[69].mxu0  ;;  %v3131_v5 = vpop.f32.mrb[69].mxu1 }
 0x17f   :  { %v4241_v21 = vpop.f32.mrb[70].mxu0  ;;  %v4243_v26 = vpop.f32.mrb[70].mxu1 }
 0x180   :  { %4734 = vst [vmem:[#allocation26_spill] sm:$0xff] %v4241_v21  ;;  %4735 = vst [vmem:[#allocation27_spill] sm:$0xff] %v4243_v26  ;;  %v3016_v50 = vpop.f32.mrb[71].mxu0  ;;  %v3132_v45 = vpop.f32.mrb[71].mxu1 }
 0x181   :  { %v3493_v45 = vld [vmem:[%s4652_s0 + $0x228] sm:$0xff]  }
 0x182   :  { %3254 = vmatmul.mubr.bf16.gmra.mrb[176].mxu0 %v3491_v0  ;;  %3370 = vmatmul.mubr.bf16.gmra.mrb[176].mxu1 %v3492_v2  ;;  %v3494_v50 = vld [vmem:[%s4652_s0 + $0x2ec] sm:$0xff]  }
 0x183   :  { %3257 = vmatprep.mubr.msk.bf16.mxu0 %vm3504_vm0, %v4719_v9  ;;  %3373 = vmatprep.mubr.msk.bf16.mxu1 %vm3504_vm0, %v4719_v9 }
 0x185   :  { %v4251_v5 = vpop.f32.mrb[72].mxu0  ;;  %v4253_v14 = vpop.f32.mrb[72].mxu1 }
 0x186   :  { %4736 = vst [vmem:[#allocation28_spill] sm:$0xff] %v4251_v5  ;;  %4737 = vst [vmem:[#allocation29_spill] sm:$0xff] %v4253_v14  ;;  %v3019_v33 = vpop.f32.mrb[73].mxu0  ;;  %v3135_v23 = vpop.f32.mrb[73].mxu1 }
 0x187   :  { %v4263_v0 = vpop.f32.mrb[74].mxu0  ;;  %v4265_v2 = vpop.f32.mrb[74].mxu1 }
 0x188   :  { %4738 = vst [vmem:[#allocation30_spill] sm:$0xff] %v4263_v0  ;;  %4739 = vst [vmem:[#allocation31_spill] sm:$0xff] %v4265_v2  ;;  %v3020_v26 = vpop.f32.mrb[75].mxu0  ;;  %v3136_v21 = vpop.f32.mrb[75].mxu1 }
 0x189   :  { %v3495_v21 = vld [vmem:[%s4652_s0 + $0x230] sm:$0xff]  }
 0x18a   :  { %3258 = vmatmul.mubr.bf16.gmra.mrb[180].mxu0 %v3493_v45  ;;  %3374 = vmatmul.mubr.bf16.gmra.mrb[180].mxu1 %v3494_v50  ;;  %v3496_v26 = vld [vmem:[%s4652_s0 + $0x2f4] sm:$0xff]  }
 0x18b   :  { %3261 = vmatprep.mubr.msk.bf16.mxu0 %vm3504_vm0, %v4719_v9  ;;  %3377 = vmatprep.mubr.msk.bf16.mxu1 %vm3504_vm0, %v4719_v9 }
 0x18d   :  { %v4273_v23 = vpop.f32.mrb[76].mxu0  ;;  %v4275_v33 = vpop.f32.mrb[76].mxu1 }
 0x18e   :  { %4740 = vst [vmem:[#allocation32_spill] sm:$0xff] %v4273_v23  ;;  %4741 = vst [vmem:[#allocation33_spill] sm:$0xff] %v4275_v33  ;;  %v3023_v14 = vpop.f32.mrb[77].mxu0  ;;  %v3139_v5 = vpop.f32.mrb[77].mxu1 }
 0x18f   :  { %v4285_v45 = vpop.f32.mrb[78].mxu0  ;;  %v4287_v50 = vpop.f32.mrb[78].mxu1 }
 0x190   :  { %4742 = vst [vmem:[#allocation34_spill] sm:$0xff] %v4285_v45  ;;  %4743 = vst [vmem:[#allocation35_spill] sm:$0xff] %v4287_v50  ;;  %v3024_v2 = vpop.f32.mrb[79].mxu0  ;;  %v3140_v0 = vpop.f32.mrb[79].mxu1 }
 0x191   :  { %v3497_v0 = vld [vmem:[%s4652_s0 + $0x238] sm:$0xff]  }
 0x192   :  { %3262 = vmatmul.mubr.bf16.gmra.mrb[184].mxu0 %v3495_v21  ;;  %3378 = vmatmul.mubr.bf16.gmra.mrb[184].mxu1 %v3496_v26  ;;  %v3498_v2 = vld [vmem:[%s4652_s0 + $0x2fc] sm:$0xff]  }
 0x193   :  { %3265 = vmatprep.mubr.msk.bf16.mxu0 %vm3504_vm0, %v4719_v9  ;;  %3381 = vmatprep.mubr.msk.bf16.mxu1 %vm3504_vm0, %v4719_v9 }
 0x195   :  { %v4295_v5 = vpop.f32.mrb[80].mxu0  ;;  %v4297_v14 = vpop.f32.mrb[80].mxu1 }
 0x196   :  { %4744 = vst [vmem:[#allocation36_spill] sm:$0xff] %v4295_v5  ;;  %4745 = vst [vmem:[#allocation37_spill] sm:$0xff] %v4297_v14  ;;  %v3027_v33 = vpop.f32.mrb[81].mxu0  ;;  %v3143_v23 = vpop.f32.mrb[81].mxu1 }
 0x197   :  { %v4307_v21 = vpop.f32.mrb[82].mxu0  ;;  %v4309_v26 = vpop.f32.mrb[82].mxu1 }
 0x198   :  { %4746 = vst [vmem:[#allocation38_spill] sm:$0xff] %v4307_v21  ;;  %4747 = vst [vmem:[#allocation39_spill] sm:$0xff] %v4309_v26  ;;  %v3028_v50 = vpop.f32.mrb[83].mxu0  ;;  %v3144_v45 = vpop.f32.mrb[83].mxu1 }
 0x199   :  { %v3499_v45 = vld [vmem:[%s4652_s0 + $0x240] sm:$0xff]  }
 0x19a   :  { %3266 = vmatmul.mubr.bf16.gmra.mrb[188].mxu0 %v3497_v0  ;;  %3382 = vmatmul.mubr.bf16.gmra.mrb[188].mxu1 %v3498_v2  ;;  %v3500_v50 = vld [vmem:[%s4652_s0 + $0x304] sm:$0xff]  }
 0x19b   :  { %3269 = vmatprep.mubr.msk.bf16.mxu0 %vm3504_vm0, %v4719_v9  ;;  %3385 = vmatprep.mubr.msk.bf16.mxu1 %vm3504_vm0, %v4719_v9 }
 0x19d   :  { %v4317_v23 = vpop.f32.mrb[84].mxu0  ;;  %v4319_v33 = vpop.f32.mrb[84].mxu1 }
 0x19e   :  { %4748 = vst [vmem:[#allocation40_spill] sm:$0xff] %v4317_v23  ;;  %4749 = vst [vmem:[#allocation41_spill] sm:$0xff] %v4319_v33  ;;  %v3031_v14 = vpop.f32.mrb[85].mxu0  ;;  %v3147_v5 = vpop.f32.mrb[85].mxu1 }
 0x19f   :  { %v4329_v0 = vpop.f32.mrb[86].mxu0  ;;  %v4331_v2 = vpop.f32.mrb[86].mxu1 }
 0x1a0   :  { %4750 = vst [vmem:[#allocation42_spill] sm:$0xff] %v4329_v0  ;;  %4751 = vst [vmem:[#allocation43_spill] sm:$0xff] %v4331_v2  ;;  %v3032_v26 = vpop.f32.mrb[87].mxu0  ;;  %v3148_v21 = vpop.f32.mrb[87].mxu1 }
 0x1a1   :  { %v3501_v21 = vld [vmem:[%s4652_s0 + $0x248] ss:$0 sps:$4 sm:$0xff]   ;;  %v3502_v26 = vld [vmem:[%s4652_s0 + $0x30c] ss:$0 sps:$4 sm:$0xff]  }
 0x1a2   :  { %3270 = vmatmul.mubr.bf16.gmra.mrb[192].mxu0 %v3499_v45  ;;  %3386 = vmatmul.mubr.bf16.gmra.mrb[192].mxu1 %v3500_v50  ;;  %v4762_v50 = vmax.f32 %v3855_v63, %v3857_v1 }
 0x1a3   :  { %3273 = vmatprep.mubr.msk.bf16.mxu0 %vm3504_vm0, %v4719_v9  ;;  %3389 = vmatprep.mubr.msk.bf16.mxu1 %vm3504_vm0, %v4719_v9 }
 0x1a5   :  { %v4339_v5 = vpop.f32.mrb[88].mxu0  ;;  %v4341_v14 = vpop.f32.mrb[88].mxu1 }
 0x1a6   :  { %4752 = vst [vmem:[#allocation44_spill] sm:$0xff] %v4339_v5  ;;  %4753 = vst [vmem:[#allocation45_spill] sm:$0xff] %v4341_v14  ;;  %v3035_v33 = vpop.f32.mrb[89].mxu0  ;;  %v3151_v23 = vpop.f32.mrb[89].mxu1 }
 0x1a7   :  { %v4351_v45 = vpop.f32.mrb[90].mxu0  ;;  %v4353_v9 = vpop.f32.mrb[90].mxu1 }
 0x1a8   :  { %4754 = vst [vmem:[#allocation46_spill] sm:$0xff] %v4351_v45  ;;  %4755 = vst [vmem:[#allocation47_spill] sm:$0xff] %v4353_v9  ;;  %v3036_v51 = vpop.f32.mrb[91].mxu0  ;;  %v3152_v2 = vpop.f32.mrb[91].mxu1 }
 0x1aa   :  { %3274 = vmatmul.mubr.bf16.gmra.mrb[196].mxu0 %v3501_v21  ;;  %3390 = vmatmul.mubr.bf16.gmra.mrb[196].mxu1 %v3502_v26 }
 0x1ad   :  { %v4357_v23 = vpop.f32.mrb[92].mxu0  ;;  %v4359_v33 = vpop.f32.mrb[92].mxu1 }
 0x1ae   :  { %4756 = vst [vmem:[#allocation48_spill] sm:$0xff] %v4357_v23  ;;  %4757 = vst [vmem:[#allocation49_spill] sm:$0xff] %v4359_v33  ;;  %v3039_v14 = vpop.f32.mrb[93].mxu0  ;;  %v3155_v5 = vpop.f32.mrb[93].mxu1 }
 0x1af   :  { %v4363_v0 = vpop.f32.mrb[94].mxu0  ;;  %v4365_v15 = vpop.f32.mrb[94].mxu1 }
 0x1b0   :  { %4758 = vst [vmem:[#allocation50_spill] sm:$0xff] %v4363_v0  ;;  %4759 = vst [vmem:[#allocation51_spill] sm:$0xff] %v4365_v15  ;;  %v3040_v51 = vpop.f32.mrb[95].mxu0  ;;  %v3156_v2 = vpop.f32.mrb[95].mxu1  ;;  %v4381_v0 = vld [vmem:[%s4653_s2] ss:$0 sm:$0xff] }
 0x1b5   :  { %v4369_v21 = vpop.f32.mrb[96].mxu0  ;;  %v4371_v26 = vpop.f32.mrb[96].mxu1 }
 0x1b6   :  { %4760 = vst [vmem:[#allocation52_spill] sm:$0xff] %v4369_v21  ;;  %4761 = vst [vmem:[#allocation53_spill] sm:$0xff] %v4371_v26  ;;  %v3043_v45 = vpop.f32.mrb[97].mxu0  ;;  %v3159_v38 = vpop.f32.mrb[97].mxu1  ;;  %v4764_v21 = vmax.f32 %v3877_v12, %v3879_v13 }
 0x1b7   :  { %v505_v14 = vpop.f32.mrb[98].mxu0  ;;  %v935_v5 = vpop.f32.mrb[98].mxu1 }
 0x1b8   :  { %v3044_v33 = vpop.f32.mrb[99].mxu0  ;;  %v3160_v23 = vpop.f32.mrb[99].mxu1 }
 0x1b9   :  { %v4763_v33 = vmax.f32 %v3867_v7, %v3869_v8 }
 0x1bd   :  { %v1219_v62 = vpop.f32.mrb[100].mxu0  ;;  %v1698_v57 = vpop.f32.mrb[100].mxu1 }
 0x1be   :  { %v1417_v51 = vmax.f32 %v4762_v50, %v1219_v62  ;;  %v3179_v2 = vpop.f32.mrb[101].mxu0  ;;  %v3295_v15 = vpop.f32.mrb[101].mxu1 }
 0x1bf   :  { %v1222_v9 = vpop.f32.mrb[102].mxu0  ;;  %v1701_v45 = vpop.f32.mrb[102].mxu1 }
 0x1c0   :  { %v1896_v38 = vmax.f32 %v1417_v51, %v1698_v57  ;;  %v1418_v23 = vmax.f32 %v4763_v33, %v1222_v9  ;;  %v3180_v14 = vpop.f32.mrb[103].mxu0  ;;  %v3296_v5 = vpop.f32.mrb[103].mxu1 }
 0x1c2   :  { %v1952_v26 = vadd.f32 %v4381_v0, %v1896_v38  ;;  %v1897_v63 = vmax.f32 %v1418_v23, %v1701_v45  ;;  %v4765_v38 = vmax.f32 %v3889_v19, %v3891_v20 }
 0x1c4   :  { %v1953_v1 = vadd.f32 %v4381_v0, %v1897_v63  ;;  %v2001_v50 = vmax.f32 %v1952_v26, 0.0 }
 0x1c5   :  { %v1227_v62 = vpop.f32.mrb[104].mxu0  ;;  %v1706_v15 = vpop.f32.mrb[104].mxu1 }
 0x1c6   :  { %v2002_v2 = vmax.f32 %v1953_v1, 0.0  ;;  %v1419_v17 = vmax.f32 %v4764_v21, %v1227_v62  ;;  %v3183_v57 = vpop.f32.mrb[105].mxu0  ;;  %v3299_v51 = vpop.f32.mrb[105].mxu1 }
 0x1c7   :  { %v1230_v3 = vpop.f32.mrb[106].mxu0  ;;  %v1709_v7 = vpop.f32.mrb[106].mxu1 }
 0x1c8   :  { %v2657_v8 = vpack.c.bf16 %v2002_v2, %v2001_v50  ;;  %v1898_v9 = vmax.f32 %v1419_v17, %v1706_v15  ;;  %v1420_v45 = vmax.f32 %v4765_v38, %v1230_v3  ;;  %v3184_v33 = vpop.f32.mrb[107].mxu0  ;;  %v3300_v23 = vpop.f32.mrb[107].mxu1  ;;  %v4766_v17 = vmax.f32 %v3899_v24, %v3901_v25 }
 0x1c9   :  { %v4767_v2 = vmax.f32 %v3911_v31, %v3913_v32  ;;  %v4768_v23 = vmax.f32 %v3921_v36, %v3923_v37 }
 0x1ca   :  { %2658 = vst [vmem:[%s4654_s3] sm:$0xff] %v2657_v8   ;;  %v1954_v26 = vadd.f32 %v4381_v0, %v1898_v9  ;;  %v1899_v12 = vmax.f32 %v1420_v45, %v1709_v7 }
 0x1cc   :  { %v1955_v13 = vadd.f32 %v4381_v0, %v1899_v12  ;;  %v2003_v5 = vmax.f32 %v1954_v26, 0.0 }
 0x1cd   :  { %v1235_v21 = vpop.f32.mrb[108].mxu0  ;;  %v1714_v14 = vpop.f32.mrb[108].mxu1 }
 0x1ce   :  { %v2004_v63 = vmax.f32 %v1955_v13, 0.0  ;;  %v1421_v19 = vmax.f32 %v4766_v17, %v1235_v21  ;;  %v3187_v20 = vpop.f32.mrb[109].mxu0  ;;  %v3303_v3 = vpop.f32.mrb[109].mxu1 }
 0x1cf   :  { %v1238_v1 = vpop.f32.mrb[110].mxu0  ;;  %v1717_v62 = vpop.f32.mrb[110].mxu1 }
 0x1d0   :  { %v2662_v15 = vpack.c.bf16 %v2004_v63, %v2003_v5  ;;  %v1900_v50 = vmax.f32 %v1421_v19, %v1714_v14  ;;  %v1422_v57 = vmax.f32 %v4767_v2, %v1238_v1  ;;  %v3188_v51 = vpop.f32.mrb[111].mxu0  ;;  %v3304_v7 = vpop.f32.mrb[111].mxu1  ;;  %v4769_v5 = vmax.f32 %v3933_v43, %v3935_v44 }
 0x1d2   :  { %2774 = vst [vmem:[%s4654_s3 + $0x8] sm:$0xff] %v2662_v15   ;;  %v1956_v8 = vadd.f32 %v4381_v0, %v1900_v50  ;;  %v1901_v24 = vmax.f32 %v1422_v57, %v1717_v62  ;;  %v4770_v50 = vmax.f32 %v3943_v48, %v3945_v49 }
 0x1d4   :  { %v1957_v25 = vadd.f32 %v4381_v0, %v1901_v24  ;;  %v2005_v45 = vmax.f32 %v1956_v8, 0.0  ;;  %v4771_v24 = vmax.f32 %v3955_v55, %v3957_v56 }
 0x1d5   :  { %v1243_v9 = vpop.f32.mrb[112].mxu0  ;;  %v1722_v38 = vpop.f32.mrb[112].mxu1 }
 0x1d6   :  { %v2006_v33 = vmax.f32 %v1957_v25, 0.0  ;;  %v1423_v31 = vmax.f32 %v4768_v23, %v1243_v9  ;;  %v3191_v32 = vpop.f32.mrb[113].mxu0  ;;  %v3307_v26 = vpop.f32.mrb[113].mxu1 }
 0x1d7   :  { %v1246_v12 = vpop.f32.mrb[114].mxu0  ;;  %v1725_v13 = vpop.f32.mrb[114].mxu1  ;;  %v4772_v26 = vmax.f32 %v3965_v60, %v3967_v61 }
 0x1d8   :  { %v2667_v21 = vpack.c.bf16 %v2006_v33, %v2005_v45  ;;  %v1902_v14 = vmax.f32 %v1423_v31, %v1722_v38  ;;  %v1424_v63 = vmax.f32 %v4769_v5, %v1246_v12  ;;  %v3192_v17 = vpop.f32.mrb[115].mxu0  ;;  %v3308_v19 = vpop.f32.mrb[115].mxu1 }
 0x1da   :  { %2775 = vst [vmem:[%s4654_s3 + $0x10] sm:$0xff] %v2667_v21   ;;  %v1958_v20 = vadd.f32 %v4381_v0, %v1902_v14  ;;  %v1903_v36 = vmax.f32 %v1424_v63, %v1725_v13  ;;  %v4773_v63 = vmax.f32 %v3977_v10, %v3979_v11 }
 0x1dc   :  { %v1959_v37 = vadd.f32 %v4381_v0, %v1903_v36  ;;  %v2007_v62 = vmax.f32 %v1958_v20, 0.0 }
 0x1dd   :  { %v1251_v3 = vpop.f32.mrb[116].mxu0  ;;  %v1730_v1 = vpop.f32.mrb[116].mxu1 }
 0x1de   :  { %v2008_v15 = vmax.f32 %v1959_v37, 0.0  ;;  %v1425_v43 = vmax.f32 %v4770_v50, %v1251_v3  ;;  %v3195_v44 = vpop.f32.mrb[117].mxu0  ;;  %v3311_v2 = vpop.f32.mrb[117].mxu1 }
 0x1df   :  { %v1254_v57 = vpop.f32.mrb[118].mxu0  ;;  %v1733_v51 = vpop.f32.mrb[118].mxu1 }
 0x1e0   :  { %v2672_v7 = vpack.c.bf16 %v2008_v15, %v2007_v62  ;;  %v1904_v8 = vmax.f32 %v1425_v43, %v1730_v1  ;;  %v1426_v25 = vmax.f32 %v4771_v24, %v1254_v57  ;;  %v3196_v9 = vpop.f32.mrb[119].mxu0  ;;  %v3312_v38 = vpop.f32.mrb[119].mxu1  ;;  %v4774_v15 = vmax.f32 %v3987_v18, %v3989_v22 }
 0x1e2   :  { %2776 = vst [vmem:[%s4654_s3 + $0x18] sm:$0xff] %v2672_v7   ;;  %v1960_v45 = vadd.f32 %v4381_v0, %v1904_v8  ;;  %v1905_v48 = vmax.f32 %v1426_v25, %v1733_v51  ;;  %v4775_v51 = vmax.f32 %v3999_v34, %v4001_v35 }
 0x1e4   :  { %v1961_v49 = vadd.f32 %v4381_v0, %v1905_v48  ;;  %v2009_v31 = vmax.f32 %v1960_v45, 0.0 }
 0x1e5   :  { %v1259_v33 = vpop.f32.mrb[120].mxu0  ;;  %v1738_v23 = vpop.f32.mrb[120].mxu1 }
 0x1e6   :  { %v2010_v32 = vmax.f32 %v1961_v49, 0.0  ;;  %v1427_v55 = vmax.f32 %v4772_v26, %v1259_v33  ;;  %v3199_v56 = vpop.f32.mrb[121].mxu0  ;;  %v3315_v12 = vpop.f32.mrb[121].mxu1  ;;  %v4776_v49 = vmax.f32 %v4009_v42, %v4011_v46 }
 0x1e7   :  { %v1262_v13 = vpop.f32.mrb[122].mxu0  ;;  %v1741_v21 = vpop.f32.mrb[122].mxu1 }
 0x1e8   :  { %v2677_v14 = vpack.c.bf16 %v2010_v32, %v2009_v31  ;;  %v1906_v5 = vmax.f32 %v1427_v55, %v1738_v23  ;;  %v1428_v17 = vmax.f32 %v4773_v63, %v1262_v13  ;;  %v3200_v19 = vpop.f32.mrb[123].mxu0  ;;  %v3316_v20 = vpop.f32.mrb[123].mxu1  ;;  %v4777_v55 = vmax.f32 %v4021_v58, %v4023_v59 }
 0x1e9   :  { %v4778_v19 = vmax.f32 %v4031_v6, %v4033_v16 }
 0x1ea   :  { %2777 = vst [vmem:[%s4654_s3 + $0x20] sm:$0xff] %v2677_v14   ;;  %v1962_v36 = vadd.f32 %v4381_v0, %v1906_v5  ;;  %v1907_v60 = vmax.f32 %v1428_v17, %v1741_v21 }
 0x1ec   :  { %v1963_v61 = vadd.f32 %v4381_v0, %v1907_v60  ;;  %v2011_v1 = vmax.f32 %v1962_v36, 0.0 }
 0x1ed   :  { %v1267_v37 = vpop.f32.mrb[124].mxu0  ;;  %v1746_v3 = vpop.f32.mrb[124].mxu1 }
 0x1ee   :  { %v2012_v62 = vmax.f32 %v1963_v61, 0.0  ;;  %v1429_v10 = vmax.f32 %v4774_v15, %v1267_v37  ;;  %v3203_v11 = vpop.f32.mrb[125].mxu0  ;;  %v3319_v50 = vpop.f32.mrb[125].mxu1 }
 0x1ef   :  { %v1270_v43 = vpop.f32.mrb[126].mxu0  ;;  %v1749_v44 = vpop.f32.mrb[126].mxu1 }
 0x1f0   :  { %v2682_v2 = vpack.c.bf16 %v2012_v62, %v2011_v1  ;;  %v1908_v57 = vmax.f32 %v1429_v10, %v1746_v3  ;;  %v1430_v7 = vmax.f32 %v4775_v51, %v1270_v43  ;;  %v3204_v8 = vpop.f32.mrb[127].mxu0  ;;  %v3320_v24 = vpop.f32.mrb[127].mxu1  ;;  %v4779_v3 = vmax.f32 %v4043_v40, %v4045_v41 }
 0x1f2   :  { %2778 = vst [vmem:[%s4654_s3 + $0x28] sm:$0xff] %v2682_v2   ;;  %v1964_v25 = vadd.f32 %v4381_v0, %v1908_v57  ;;  %v1909_v18 = vmax.f32 %v1430_v7, %v1749_v44  ;;  %v4780_v2 = vmax.f32 %v4053_v54, %v4055_v4 }
 0x1f4   :  { %v1965_v22 = vadd.f32 %v4381_v0, %v1909_v18  ;;  %v2013_v45 = vmax.f32 %v1964_v25, 0.0  ;;  %v4781_v25 = vmax.f32 %v4065_v52, %v4067_v53 }
 0x1f5   :  { %v1275_v9 = vpop.f32.mrb[128].mxu0  ;;  %v1754_v38 = vpop.f32.mrb[128].mxu1 }
 0x1f6   :  { %v2014_v48 = vmax.f32 %v1965_v22, 0.0  ;;  %v1431_v34 = vmax.f32 %v4776_v49, %v1275_v9  ;;  %v3207_v35 = vpop.f32.mrb[129].mxu0  ;;  %v3323_v33 = vpop.f32.mrb[129].mxu1 }
 0x1f7   :  { %v1278_v23 = vpop.f32.mrb[130].mxu0  ;;  %v1757_v31 = vpop.f32.mrb[130].mxu1  ;;  %v4782_v35 = vmax.f32 %v4075_v27, %v4077_v28 }
 0x1f8   :  { %v2687_v32 = vpack.c.bf16 %v2014_v48, %v2013_v45  ;;  %v1910_v26 = vmax.f32 %v1431_v34, %v1754_v38  ;;  %v1432_v56 = vmax.f32 %v4777_v55, %v1278_v23  ;;  %v3208_v12 = vpop.f32.mrb[131].mxu0  ;;  %v3324_v13 = vpop.f32.mrb[131].mxu1  ;;  %v4783_v55 = vmax.f32 %v4087_v29, %v4089_v30 }
 0x1fa   :  { %2779 = vst [vmem:[%s4654_s3 + $0x30] sm:$0xff] %v2687_v32   ;;  %v1966_v21 = vadd.f32 %v4381_v0, %v1910_v26  ;;  %v1911_v42 = vmax.f32 %v1432_v56, %v1757_v31 }
 0x1fc   :  { %v1967_v46 = vadd.f32 %v4381_v0, %v1911_v42  ;;  %v2015_v63 = vmax.f32 %v1966_v21, 0.0 }
 0x1fd   :  { %v1283_v14 = vpop.f32.mrb[132].mxu0  ;;  %v1762_v5 = vpop.f32.mrb[132].mxu1 }
 0x1fe   :  { %v2016_v17 = vmax.f32 %v1967_v46, 0.0  ;;  %v1433_v58 = vmax.f32 %v4778_v19, %v1283_v14  ;;  %v3211_v59 = vpop.f32.mrb[133].mxu0  ;;  %v3327_v20 = vpop.f32.mrb[133].mxu1 }
 0x1ff   :  { %v1286_v36 = vpop.f32.mrb[134].mxu0  ;;  %v1765_v60 = vpop.f32.mrb[134].mxu1 }
 0x200   :  { %v2692_v61 = vpack.c.bf16 %v2016_v17, %v2015_v63  ;;  %v1912_v37 = vmax.f32 %v1433_v58, %v1762_v5  ;;  %v1434_v1 = vmax.f32 %v4779_v3, %v1286_v36  ;;  %v3212_v62 = vpop.f32.mrb[135].mxu0  ;;  %v3328_v15 = vpop.f32.mrb[135].mxu1  ;;  %v4784_v63 = vmax.f32 %v4097_v39, %v4099_v47  ;;  %v4785_v36 = vld [vmem:[#allocation2_spill] sm:$0xff] }
 0x202   :  { %2780 = vst [vmem:[%s4654_s3 + $0x38] sm:$0xff] %v2692_v61   ;;  %v1968_v10 = vadd.f32 %v4381_v0, %v1912_v37  ;;  %v1913_v6 = vmax.f32 %v1434_v1, %v1765_v60  ;;  %v4786_v60 = vld [vmem:[#allocation3_spill] sm:$0xff] }
 0x203   :  { %v4787_v61 = vmax.f32 %v4785_v36, %v4786_v60 }
 0x204   :  { %v1969_v16 = vadd.f32 %v4381_v0, %v1913_v6  ;;  %v2017_v43 = vmax.f32 %v1968_v10, 0.0 }
 0x205   :  { %v1291_v11 = vpop.f32.mrb[136].mxu0  ;;  %v1770_v50 = vpop.f32.mrb[136].mxu1 }
 0x206   :  { %v2018_v44 = vmax.f32 %v1969_v16, 0.0  ;;  %v1435_v40 = vmax.f32 %v4780_v2, %v1291_v11  ;;  %v3215_v41 = vpop.f32.mrb[137].mxu0  ;;  %v3331_v57 = vpop.f32.mrb[137].mxu1  ;;  %v4788_v11 = vld [vmem:[#allocation4_spill] sm:$0xff] }
 0x207   :  { %v1294_v51 = vpop.f32.mrb[138].mxu0  ;;  %v1773_v7 = vpop.f32.mrb[138].mxu1 }
 0x208   :  { %v2697_v8 = vpack.c.bf16 %v2018_v44, %v2017_v43  ;;  %v1914_v24 = vmax.f32 %v1435_v40, %v1770_v50  ;;  %v1436_v18 = vmax.f32 %v4781_v25, %v1294_v51  ;;  %v3216_v22 = vpop.f32.mrb[139].mxu0  ;;  %v3332_v9 = vpop.f32.mrb[139].mxu1  ;;  %v4789_v50 = vld [vmem:[#allocation5_spill] sm:$0xff] }
 0x209   :  { %v4790_v43 = vmax.f32 %v4788_v11, %v4789_v50 }
 0x20a   :  { %2781 = vst [vmem:[%s4654_s3 + $0x40] sm:$0xff] %v2697_v8   ;;  %v1970_v38 = vadd.f32 %v4381_v0, %v1914_v24  ;;  %v1915_v54 = vmax.f32 %v1436_v18, %v1773_v7  ;;  %v4791_v8 = vld [vmem:[#allocation6_spill] sm:$0xff]  ;;  %v4792_v24 = vld [vmem:[#allocation7_spill] sm:$0xff] }
 0x20b   :  { %v4793_v25 = vmax.f32 %v4791_v8, %v4792_v24 }
 0x20c   :  { %v1971_v4 = vadd.f32 %v4381_v0, %v1915_v54  ;;  %v2019_v49 = vmax.f32 %v1970_v38, 0.0 }
 0x20d   :  { %v1299_v45 = vpop.f32.mrb[140].mxu0  ;;  %v1778_v48 = vpop.f32.mrb[140].mxu1 }
 0x20e   :  { %v2020_v34 = vmax.f32 %v1971_v4, 0.0  ;;  %v1437_v52 = vmax.f32 %v4782_v35, %v1299_v45  ;;  %v3219_v53 = vpop.f32.mrb[141].mxu0  ;;  %v3335_v33 = vpop.f32.mrb[141].mxu1  ;;  %v4794_v35 = vld [vmem:[#allocation8_spill] sm:$0xff] }
 0x20f   :  { %v1302_v23 = vpop.f32.mrb[142].mxu0  ;;  %v1781_v31 = vpop.f32.mrb[142].mxu1 }
 0x210   :  { %v2702_v32 = vpack.c.bf16 %v2020_v34, %v2019_v49  ;;  %v1916_v26 = vmax.f32 %v1437_v52, %v1778_v48  ;;  %v1438_v56 = vmax.f32 %v4783_v55, %v1302_v23  ;;  %v3220_v12 = vpop.f32.mrb[143].mxu0  ;;  %v3336_v13 = vpop.f32.mrb[143].mxu1  ;;  %v4795_v52 = vld [vmem:[#allocation9_spill] sm:$0xff] }
 0x211   :  { %v4796_v53 = vmax.f32 %v4794_v35, %v4795_v52  ;;  %v4797_v12 = vld [vmem:[#allocation10_spill] sm:$0xff]  ;;  %v4798_v13 = vld [vmem:[#allocation11_spill] sm:$0xff] }
 0x212   :  { %2782 = vst [vmem:[%s4654_s3 + $0x48] sm:$0xff] %v2702_v32   ;;  %v1972_v21 = vadd.f32 %v4381_v0, %v1916_v26  ;;  %v1917_v27 = vmax.f32 %v1438_v56, %v1781_v31 }
 0x214   :  { %v1973_v28 = vadd.f32 %v4381_v0, %v1917_v27  ;;  %v2021_v14 = vmax.f32 %v1972_v21, 0.0  ;;  %v4799_v21 = vmax.f32 %v4797_v12, %v4798_v13 }
 0x215   :  { %v1307_v42 = vpop.f32.mrb[144].mxu0  ;;  %v1786_v46 = vpop.f32.mrb[144].mxu1 }
 0x216   :  { %v2022_v5 = vmax.f32 %v1973_v28, 0.0  ;;  %v1439_v29 = vmax.f32 %v4784_v63, %v1307_v42  ;;  %v3223_v30 = vpop.f32.mrb[145].mxu0  ;;  %v3339_v17 = vpop.f32.mrb[145].mxu1 }
 0x217   :  { %v1310_v19 = vpop.f32.mrb[146].mxu0  ;;  %v1789_v58 = vpop.f32.mrb[146].mxu1 }
 0x218   :  { %v2707_v59 = vpack.c.bf16 %v2022_v5, %v2021_v14  ;;  %v1918_v20 = vmax.f32 %v1439_v29, %v1786_v46  ;;  %v1440_v37 = vmax.f32 %v4787_v61, %v1310_v19  ;;  %v3224_v3 = vpop.f32.mrb[147].mxu0  ;;  %v3340_v1 = vpop.f32.mrb[147].mxu1  ;;  %v4800_v19 = vld [vmem:[#allocation12_spill] sm:$0xff] }
 0x21a   :  { %2783 = vst [vmem:[%s4654_s3 + $0x50] sm:$0xff] %v2707_v59   ;;  %v1974_v62 = vadd.f32 %v4381_v0, %v1918_v20  ;;  %v1919_v39 = vmax.f32 %v1440_v37, %v1789_v58  ;;  %v4801_v58 = vld [vmem:[#allocation13_spill] sm:$0xff] }
 0x21b   :  { %v4802_v59 = vmax.f32 %v4800_v19, %v4801_v58 }
 0x21c   :  { %v1975_v47 = vadd.f32 %v4381_v0, %v1919_v39  ;;  %v2023_v6 = vmax.f32 %v1974_v62, 0.0  ;;  %v4803_v62 = vld [vmem:[#allocation14_spill] sm:$0xff]  ;;  %v4804_v39 = vld [vmem:[#allocation15_spill] sm:$0xff] }
 0x21d   :  { %v1315_v15 = vpop.f32.mrb[148].mxu0  ;;  %v1794_v10 = vpop.f32.mrb[148].mxu1 }
 0x21e   :  { %v2024_v16 = vmax.f32 %v1975_v47, 0.0  ;;  %v1441_v44 = vmax.f32 %v4790_v43, %v1315_v15  ;;  %v3227_v2 = vpop.f32.mrb[149].mxu0  ;;  %v3343_v40 = vpop.f32.mrb[149].mxu1  ;;  %v4805_v47 = vmax.f32 %v4803_v62, %v4804_v39 }
 0x21f   :  { %v1318_v41 = vpop.f32.mrb[150].mxu0  ;;  %v1797_v57 = vpop.f32.mrb[150].mxu1 }
 0x220   :  { %v2712_v51 = vpack.c.bf16 %v2024_v16, %v2023_v6  ;;  %v1920_v7 = vmax.f32 %v1441_v44, %v1794_v10  ;;  %v1442_v18 = vmax.f32 %v4793_v25, %v1318_v41  ;;  %v3228_v22 = vpop.f32.mrb[151].mxu0  ;;  %v3344_v9 = vpop.f32.mrb[151].mxu1  ;;  %v4806_v41 = vld [vmem:[#allocation16_spill] sm:$0xff] }
 0x222   :  { %2784 = vst [vmem:[%s4654_s3 + $0x58] sm:$0xff] %v2712_v51   ;;  %v1976_v38 = vadd.f32 %v4381_v0, %v1920_v7  ;;  %v1921_v54 = vmax.f32 %v1442_v18, %v1797_v57  ;;  %v4807_v57 = vld [vmem:[#allocation17_spill] sm:$0xff] }
 0x223   :  { %v4808_v51 = vmax.f32 %v4806_v41, %v4807_v57 }
 0x224   :  { %v1977_v4 = vadd.f32 %v4381_v0, %v1921_v54  ;;  %v2025_v49 = vmax.f32 %v1976_v38, 0.0  ;;  %v4809_v38 = vld [vmem:[#allocation18_spill] sm:$0xff]  ;;  %v4810_v54 = vld [vmem:[#allocation19_spill] sm:$0xff] }
 0x225   :  { %v1323_v45 = vpop.f32.mrb[152].mxu0  ;;  %v1802_v48 = vpop.f32.mrb[152].mxu1 }
 0x226   :  { %v2026_v34 = vmax.f32 %v1977_v4, 0.0  ;;  %v1443_v33 = vmax.f32 %v4796_v53, %v1323_v45  ;;  %v3231_v23 = vpop.f32.mrb[153].mxu0  ;;  %v3347_v31 = vpop.f32.mrb[153].mxu1  ;;  %v4811_v4 = vmax.f32 %v4809_v38, %v4810_v54 }
 0x227   :  { %v1326_v32 = vpop.f32.mrb[154].mxu0  ;;  %v1805_v26 = vpop.f32.mrb[154].mxu1 }
 0x228   :  { %v2717_v55 = vpack.c.bf16 %v2026_v34, %v2025_v49  ;;  %v1922_v56 = vmax.f32 %v1443_v33, %v1802_v48  ;;  %v1444_v27 = vmax.f32 %v4799_v21, %v1326_v32  ;;  %v3232_v28 = vpop.f32.mrb[155].mxu0  ;;  %v3348_v42 = vpop.f32.mrb[155].mxu1  ;;  %v4812_v32 = vld [vmem:[#allocation20_spill] sm:$0xff] }
 0x22a   :  { %2785 = vst [vmem:[%s4654_s3 + $0x60] sm:$0xff] %v2717_v55   ;;  %v1978_v46 = vadd.f32 %v4381_v0, %v1922_v56  ;;  %v1923_v14 = vmax.f32 %v1444_v27, %v1805_v26  ;;  %v4813_v26 = vld [vmem:[#allocation21_spill] sm:$0xff] }
 0x22b   :  { %v4814_v55 = vmax.f32 %v4812_v32, %v4813_v26 }
 0x22c   :  { %v1979_v5 = vadd.f32 %v4381_v0, %v1923_v14  ;;  %v2027_v30 = vmax.f32 %v1978_v46, 0.0  ;;  %v4815_v46 = vld [vmem:[#allocation22_spill] sm:$0xff]  ;;  %v4816_v14 = vld [vmem:[#allocation23_spill] sm:$0xff] }
 0x22d   :  { %v1331_v63 = vpop.f32.mrb[156].mxu0  ;;  %v1810_v29 = vpop.f32.mrb[156].mxu1 }
 0x22e   :  { %v2028_v17 = vmax.f32 %v1979_v5, 0.0  ;;  %v1445_v20 = vmax.f32 %v4802_v59, %v1331_v63  ;;  %v3235_v36 = vpop.f32.mrb[157].mxu0  ;;  %v3351_v60 = vpop.f32.mrb[157].mxu1  ;;  %v4817_v5 = vmax.f32 %v4815_v46, %v4816_v14 }
 0x22f   :  { %v1334_v61 = vpop.f32.mrb[158].mxu0  ;;  %v1813_v37 = vpop.f32.mrb[158].mxu1 }
 0x230   :  { %v2722_v3 = vpack.c.bf16 %v2028_v17, %v2027_v30  ;;  %v1924_v1 = vmax.f32 %v1445_v20, %v1810_v29  ;;  %v1446_v15 = vmax.f32 %v4805_v47, %v1334_v61  ;;  %v3236_v10 = vpop.f32.mrb[159].mxu0  ;;  %v3352_v6 = vpop.f32.mrb[159].mxu1  ;;  %v4818_v61 = vld [vmem:[#allocation24_spill] sm:$0xff] }
 0x232   :  { %2786 = vst [vmem:[%s4654_s3 + $0x68] sm:$0xff] %v2722_v3   ;;  %v1980_v16 = vadd.f32 %v4381_v0, %v1924_v1  ;;  %v1925_v11 = vmax.f32 %v1446_v15, %v1813_v37  ;;  %v4819_v37 = vld [vmem:[#allocation25_spill] sm:$0xff] }
 0x233   :  { %v4820_v3 = vmax.f32 %v4818_v61, %v4819_v37 }
 0x234   :  { %v1981_v50 = vadd.f32 %v4381_v0, %v1925_v11  ;;  %v2029_v2 = vmax.f32 %v1980_v16, 0.0  ;;  %v4821_v16 = vld [vmem:[#allocation26_spill] sm:$0xff]  ;;  %v4822_v11 = vld [vmem:[#allocation27_spill] sm:$0xff] }
 0x235   :  { %v1339_v43 = vpop.f32.mrb[160].mxu0  ;;  %v1818_v44 = vpop.f32.mrb[160].mxu1 }
 0x236   :  { %v2030_v40 = vmax.f32 %v1981_v50, 0.0  ;;  %v1447_v7 = vmax.f32 %v4808_v51, %v1339_v43  ;;  %v3239_v8 = vpop.f32.mrb[161].mxu0  ;;  %v3355_v24 = vpop.f32.mrb[161].mxu1  ;;  %v4823_v50 = vmax.f32 %v4821_v16, %v4822_v11 }
 0x237   :  { %v1342_v25 = vpop.f32.mrb[162].mxu0  ;;  %v1821_v18 = vpop.f32.mrb[162].mxu1 }
 0x238   :  { %v2727_v22 = vpack.c.bf16 %v2030_v40, %v2029_v2  ;;  %v1926_v9 = vmax.f32 %v1447_v7, %v1818_v44  ;;  %v1448_v45 = vmax.f32 %v4811_v4, %v1342_v25  ;;  %v3240_v48 = vpop.f32.mrb[163].mxu0  ;;  %v3356_v49 = vpop.f32.mrb[163].mxu1  ;;  %v4824_v25 = vld [vmem:[#allocation28_spill] sm:$0xff] }
 0x23a   :  { %2787 = vst [vmem:[%s4654_s3 + $0x70] sm:$0xff] %v2727_v22   ;;  %v1982_v34 = vadd.f32 %v4381_v0, %v1926_v9  ;;  %v1927_v35 = vmax.f32 %v1448_v45, %v1821_v18  ;;  %v4825_v18 = vld [vmem:[#allocation29_spill] sm:$0xff] }
 0x23b   :  { %v4826_v22 = vmax.f32 %v4824_v25, %v4825_v18 }
 0x23c   :  { %v1983_v52 = vadd.f32 %v4381_v0, %v1927_v35  ;;  %v2031_v23 = vmax.f32 %v1982_v34, 0.0  ;;  %v4827_v34 = vld [vmem:[#allocation30_spill] sm:$0xff]  ;;  %v4828_v35 = vld [vmem:[#allocation31_spill] sm:$0xff] }
 0x23d   :  { %v1347_v53 = vpop.f32.mrb[164].mxu0  ;;  %v1826_v33 = vpop.f32.mrb[164].mxu1 }
 0x23e   :  { %v2032_v31 = vmax.f32 %v1983_v52, 0.0  ;;  %v1449_v56 = vmax.f32 %v4814_v55, %v1347_v53  ;;  %v3243_v12 = vpop.f32.mrb[165].mxu0  ;;  %v3359_v13 = vpop.f32.mrb[165].mxu1  ;;  %v4829_v52 = vmax.f32 %v4827_v34, %v4828_v35 }
 0x23f   :  { %v1350_v21 = vpop.f32.mrb[166].mxu0  ;;  %v1829_v27 = vpop.f32.mrb[166].mxu1 }
 0x240   :  { %v2732_v28 = vpack.c.bf16 %v2032_v31, %v2031_v23  ;;  %v1928_v42 = vmax.f32 %v1449_v56, %v1826_v33  ;;  %v1450_v63 = vmax.f32 %v4817_v5, %v1350_v21  ;;  %v3244_v29 = vpop.f32.mrb[167].mxu0  ;;  %v3360_v30 = vpop.f32.mrb[167].mxu1  ;;  %v4830_v21 = vld [vmem:[#allocation32_spill] sm:$0xff] }
 0x242   :  { %2788 = vst [vmem:[%s4654_s3 + $0x78] sm:$0xff] %v2732_v28   ;;  %v1984_v17 = vadd.f32 %v4381_v0, %v1928_v42  ;;  %v1929_v19 = vmax.f32 %v1450_v63, %v1829_v27  ;;  %v4831_v27 = vld [vmem:[#allocation33_spill] sm:$0xff] }
 0x243   :  { %v4832_v28 = vmax.f32 %v4830_v21, %v4831_v27 }
 0x244   :  { %v1985_v58 = vadd.f32 %v4381_v0, %v1929_v19  ;;  %v2033_v36 = vmax.f32 %v1984_v17, 0.0  ;;  %v4833_v17 = vld [vmem:[#allocation34_spill] sm:$0xff]  ;;  %v4834_v19 = vld [vmem:[#allocation35_spill] sm:$0xff] }
 0x245   :  { %v1355_v59 = vpop.f32.mrb[168].mxu0  ;;  %v1834_v20 = vpop.f32.mrb[168].mxu1 }
 0x246   :  { %v2034_v60 = vmax.f32 %v1985_v58, 0.0  ;;  %v1451_v1 = vmax.f32 %v4820_v3, %v1355_v59  ;;  %v3247_v62 = vpop.f32.mrb[169].mxu0  ;;  %v3363_v39 = vpop.f32.mrb[169].mxu1  ;;  %v4835_v58 = vmax.f32 %v4833_v17, %v4834_v19 }
 0x247   :  { %v1358_v47 = vpop.f32.mrb[170].mxu0  ;;  %v1837_v15 = vpop.f32.mrb[170].mxu1 }
 0x248   :  { %v2737_v10 = vpack.c.bf16 %v2034_v60, %v2033_v36  ;;  %v1930_v6 = vmax.f32 %v1451_v1, %v1834_v20  ;;  %v1452_v43 = vmax.f32 %v4823_v50, %v1358_v47  ;;  %v3248_v44 = vpop.f32.mrb[171].mxu0  ;;  %v3364_v2 = vpop.f32.mrb[171].mxu1  ;;  %v4836_v47 = vld [vmem:[#allocation36_spill] sm:$0xff] }
 0x24a   :  { %2789 = vst [vmem:[%s4654_s3 + $0x80] sm:$0xff] %v2737_v10   ;;  %v1986_v40 = vadd.f32 %v4381_v0, %v1930_v6  ;;  %v1931_v41 = vmax.f32 %v1452_v43, %v1837_v15  ;;  %v4837_v15 = vld [vmem:[#allocation37_spill] sm:$0xff] }
 0x24b   :  { %v4838_v10 = vmax.f32 %v4836_v47, %v4837_v15 }
 0x24c   :  { %v1987_v57 = vadd.f32 %v4381_v0, %v1931_v41  ;;  %v2035_v8 = vmax.f32 %v1986_v40, 0.0  ;;  %v4839_v40 = vld [vmem:[#allocation38_spill] sm:$0xff]  ;;  %v4840_v41 = vld [vmem:[#allocation39_spill] sm:$0xff] }
 0x24d   :  { %v1363_v51 = vpop.f32.mrb[172].mxu0  ;;  %v1842_v7 = vpop.f32.mrb[172].mxu1 }
 0x24e   :  { %v2036_v24 = vmax.f32 %v1987_v57, 0.0  ;;  %v1453_v9 = vmax.f32 %v4826_v22, %v1363_v51  ;;  %v3251_v38 = vpop.f32.mrb[173].mxu0  ;;  %v3367_v54 = vpop.f32.mrb[173].mxu1  ;;  %v4841_v57 = vmax.f32 %v4839_v40, %v4840_v41 }
 0x24f   :  { %v1366_v4 = vpop.f32.mrb[174].mxu0  ;;  %v1845_v45 = vpop.f32.mrb[174].mxu1 }
 0x250   :  { %v2742_v48 = vpack.c.bf16 %v2036_v24, %v2035_v8  ;;  %v1932_v49 = vmax.f32 %v1453_v9, %v1842_v7  ;;  %v1454_v53 = vmax.f32 %v4829_v52, %v1366_v4  ;;  %v3252_v33 = vpop.f32.mrb[175].mxu0  ;;  %v3368_v23 = vpop.f32.mrb[175].mxu1  ;;  %v4842_v4 = vld [vmem:[#allocation40_spill] sm:$0xff] }
 0x252   :  { %2790 = vst [vmem:[%s4654_s3 + $0x88] sm:$0xff] %v2742_v48   ;;  %v1988_v31 = vadd.f32 %v4381_v0, %v1932_v49  ;;  %v1933_v32 = vmax.f32 %v1454_v53, %v1845_v45  ;;  %v4843_v45 = vld [vmem:[#allocation41_spill] sm:$0xff] }
 0x253   :  { %v4844_v48 = vmax.f32 %v4842_v4, %v4843_v45 }
 0x254   :  { %v1989_v26 = vadd.f32 %v4381_v0, %v1933_v32  ;;  %v2037_v12 = vmax.f32 %v1988_v31, 0.0  ;;  %v4845_v31 = vld [vmem:[#allocation42_spill] sm:$0xff]  ;;  %v4846_v32 = vld [vmem:[#allocation43_spill] sm:$0xff] }
 0x255   :  { %v1371_v55 = vpop.f32.mrb[176].mxu0  ;;  %v1850_v56 = vpop.f32.mrb[176].mxu1 }
 0x256   :  { %v2038_v13 = vmax.f32 %v1989_v26, 0.0  ;;  %v1455_v42 = vmax.f32 %v4832_v28, %v1371_v55  ;;  %v3255_v46 = vpop.f32.mrb[177].mxu0  ;;  %v3371_v14 = vpop.f32.mrb[177].mxu1  ;;  %v4847_v26 = vmax.f32 %v4845_v31, %v4846_v32 }
 0x257   :  { %v1374_v5 = vpop.f32.mrb[178].mxu0  ;;  %v1853_v63 = vpop.f32.mrb[178].mxu1 }
 0x258   :  { %v2747_v29 = vpack.c.bf16 %v2038_v13, %v2037_v12  ;;  %v1934_v30 = vmax.f32 %v1455_v42, %v1850_v56  ;;  %v1456_v59 = vmax.f32 %v4835_v58, %v1374_v5  ;;  %v3256_v20 = vpop.f32.mrb[179].mxu0  ;;  %v3372_v36 = vpop.f32.mrb[179].mxu1  ;;  %v4848_v5 = vld [vmem:[#allocation44_spill] sm:$0xff] }
 0x25a   :  { %2791 = vst [vmem:[%s4654_s3 + $0x90] sm:$0xff] %v2747_v29   ;;  %v1990_v60 = vadd.f32 %v4381_v0, %v1934_v30  ;;  %v1935_v61 = vmax.f32 %v1456_v59, %v1853_v63  ;;  %v4849_v63 = vld [vmem:[#allocation45_spill] sm:$0xff] }
 0x25b   :  { %v4850_v29 = vmax.f32 %v4848_v5, %v4849_v63 }
 0x25c   :  { %v1991_v37 = vadd.f32 %v4381_v0, %v1935_v61  ;;  %v2039_v62 = vmax.f32 %v1990_v60, 0.0  ;;  %v4851_v60 = vld [vmem:[#allocation46_spill] sm:$0xff]  ;;  %v4852_v61 = vld [vmem:[#allocation47_spill] sm:$0xff] }
 0x25d   :  { %v1379_v3 = vpop.f32.mrb[180].mxu0  ;;  %v1858_v1 = vpop.f32.mrb[180].mxu1 }
 0x25e   :  { %v2040_v39 = vmax.f32 %v1991_v37, 0.0  ;;  %v1457_v6 = vmax.f32 %v4838_v10, %v1379_v3  ;;  %v3259_v16 = vpop.f32.mrb[181].mxu0  ;;  %v3375_v11 = vpop.f32.mrb[181].mxu1  ;;  %v4853_v37 = vmax.f32 %v4851_v60, %v4852_v61 }
 0x25f   :  { %v1382_v50 = vpop.f32.mrb[182].mxu0  ;;  %v1861_v43 = vpop.f32.mrb[182].mxu1 }
 0x260   :  { %v2752_v44 = vpack.c.bf16 %v2040_v39, %v2039_v62  ;;  %v1936_v2 = vmax.f32 %v1457_v6, %v1858_v1  ;;  %v1458_v51 = vmax.f32 %v4841_v57, %v1382_v50  ;;  %v3260_v7 = vpop.f32.mrb[183].mxu0  ;;  %v3376_v8 = vpop.f32.mrb[183].mxu1  ;;  %v4854_v50 = vld [vmem:[#allocation48_spill] sm:$0xff] }
 0x262   :  { %2792 = vst [vmem:[%s4654_s3 + $0x98] sm:$0xff] %v2752_v44   ;;  %v1992_v24 = vadd.f32 %v4381_v0, %v1936_v2  ;;  %v1937_v25 = vmax.f32 %v1458_v51, %v1861_v43  ;;  %v4855_v43 = vld [vmem:[#allocation49_spill] sm:$0xff] }
 0x263   :  { %v4856_v44 = vmax.f32 %v4854_v50, %v4855_v43 }
 0x264   :  { %v1993_v18 = vadd.f32 %v4381_v0, %v1937_v25  ;;  %v2041_v38 = vmax.f32 %v1992_v24, 0.0  ;;  %v4857_v24 = vld [vmem:[#allocation50_spill] sm:$0xff]  ;;  %v4858_v25 = vld [vmem:[#allocation51_spill] sm:$0xff] }
 0x265   :  { %v1387_v22 = vpop.f32.mrb[184].mxu0  ;;  %v1866_v9 = vpop.f32.mrb[184].mxu1 }
 0x266   :  { %v2042_v54 = vmax.f32 %v1993_v18, 0.0  ;;  %v1459_v49 = vmax.f32 %v4844_v48, %v1387_v22  ;;  %v3263_v34 = vpop.f32.mrb[185].mxu0  ;;  %v3379_v35 = vpop.f32.mrb[185].mxu1  ;;  %v4859_v18 = vmax.f32 %v4857_v24, %v4858_v25 }
 0x267   :  { %v1390_v52 = vpop.f32.mrb[186].mxu0  ;;  %v1869_v53 = vpop.f32.mrb[186].mxu1 }
 0x268   :  { %v2757_v33 = vpack.c.bf16 %v2042_v54, %v2041_v38  ;;  %v1938_v23 = vmax.f32 %v1459_v49, %v1866_v9  ;;  %v1460_v55 = vmax.f32 %v4847_v26, %v1390_v52  ;;  %v3264_v56 = vpop.f32.mrb[187].mxu0  ;;  %v3380_v12 = vpop.f32.mrb[187].mxu1  ;;  %v4860_v52 = vld [vmem:[#allocation52_spill] sm:$0xff] }
 0x26a   :  { %2793 = vst [vmem:[%s4654_s3 + $0xa0] sm:$0xff] %v2757_v33   ;;  %v1994_v13 = vadd.f32 %v4381_v0, %v1938_v23  ;;  %v1939_v21 = vmax.f32 %v1460_v55, %v1869_v53  ;;  %v4861_v53 = vld [vmem:[#allocation53_spill] sm:$0xff] }
 0x26b   :  { %v4862_v33 = vmax.f32 %v4860_v52, %v4861_v53 }
 0x26c   :  { %v1995_v27 = vadd.f32 %v4381_v0, %v1939_v21  ;;  %v2043_v46 = vmax.f32 %v1994_v13, 0.0 }
 0x26d   :  { %v1395_v28 = vpop.f32.mrb[188].mxu0  ;;  %v1874_v42 = vpop.f32.mrb[188].mxu1 }
 0x26e   :  { %v2044_v14 = vmax.f32 %v1995_v27, 0.0  ;;  %v1461_v30 = vmax.f32 %v4850_v29, %v1395_v28  ;;  %v3267_v17 = vpop.f32.mrb[189].mxu0  ;;  %v3383_v19 = vpop.f32.mrb[189].mxu1 }
 0x26f   :  { %v1398_v58 = vpop.f32.mrb[190].mxu0  ;;  %v1877_v59 = vpop.f32.mrb[190].mxu1 }
 0x270   :  { %v2762_v20 = vpack.c.bf16 %v2044_v14, %v2043_v46  ;;  %v1940_v36 = vmax.f32 %v1461_v30, %v1874_v42  ;;  %v1462_v3 = vmax.f32 %v4853_v37, %v1398_v58  ;;  %v3268_v1 = vpop.f32.mrb[191].mxu0  ;;  %v3384_v62 = vpop.f32.mrb[191].mxu1 }
 0x272   :  { %2794 = vst [vmem:[%s4654_s3 + $0xa8] sm:$0xff] %v2762_v20   ;;  %v1996_v39 = vadd.f32 %v4381_v0, %v1940_v36  ;;  %v1941_v47 = vmax.f32 %v1462_v3, %v1877_v59 }
 0x274   :  { %v1997_v15 = vadd.f32 %v4381_v0, %v1941_v47  ;;  %v2045_v16 = vmax.f32 %v1996_v39, 0.0 }
 0x275   :  { %v1403_v10 = vpop.f32.mrb[192].mxu0  ;;  %v1882_v6 = vpop.f32.mrb[192].mxu1 }
 0x276   :  { %v2046_v11 = vmax.f32 %v1997_v15, 0.0  ;;  %v1463_v2 = vmax.f32 %v4856_v44, %v1403_v10  ;;  %v3271_v40 = vpop.f32.mrb[193].mxu0  ;;  %v3387_v41 = vpop.f32.mrb[193].mxu1 }
 0x277   :  { %v1406_v57 = vpop.f32.mrb[194].mxu0  ;;  %v1885_v51 = vpop.f32.mrb[194].mxu1 }
 0x278   :  { %v2767_v7 = vpack.c.bf16 %v2046_v11, %v2045_v16  ;;  %v1942_v8 = vmax.f32 %v1463_v2, %v1882_v6  ;;  %v1464_v22 = vmax.f32 %v4859_v18, %v1406_v57  ;;  %v3272_v9 = vpop.f32.mrb[195].mxu0  ;;  %v3388_v38 = vpop.f32.mrb[195].mxu1 }
 0x27a   :  { %2795 = vst [vmem:[%s4654_s3 + $0xb0] sm:$0xff] %v2767_v7   ;;  %v1998_v54 = vadd.f32 %v4381_v0, %v1942_v8  ;;  %v1943_v4 = vmax.f32 %v1464_v22, %v1885_v51 }
 0x27c   :  { %v1999_v45 = vadd.f32 %v4381_v0, %v1943_v4  ;;  %v2047_v34 = vmax.f32 %v1998_v54, 0.0 }
 0x27d   :  { %v1411_v48 = vpop.f32.mrb[196].mxu0  ;;  %v1890_v49 = vpop.f32.mrb[196].mxu1 }
 0x27e   :  { %v2048_v35 = vmax.f32 %v1999_v45, 0.0  ;;  %v1465_v23 = vmax.f32 %v4862_v33, %v1411_v48  ;;  %v3275_v31 = vpop.f32.mrb[197].mxu0  ;;  %v3391_v32 = vpop.f32.mrb[197].mxu1 }
 0x27f   :  { %v1414_v26 = vpop.f32.mrb[198].mxu0  ;;  %v1893_v55 = vpop.f32.mrb[198].mxu1 }
 0x280   :  { %v2772_v56 = vpack.c.bf16 %v2048_v35, %v2047_v34  ;;  %v1944_v12 = vmax.f32 %v1465_v23, %v1890_v49  ;;  %v3276_v13 = vpop.f32.mrb[199].mxu0  ;;  %v3392_v21 = vpop.f32.mrb[199].mxu1 }
 0x282   :  { %2796 = vst [vmem:[%s4654_s3 + $0xb8] sm:$0xff] %v2772_v56   ;;  %v2000_v27 = vadd.f32 %v4381_v0, %v1944_v12 }
 0x284   :  { %v2049_v28 = vmax.f32 %v2000_v27, 0.0 }
 0x286   :  { %v2653_v42 = vpack.c.bf16 %v2049_v28, %v2049_v28 }
 0x288   :  { %2295 = vst [vmem:[%s4654_s3 + $0xc0] sm:$0xf] %v2653_v42 }

// kernel: net_forward.4
= control target key start
LH: loop header
LB: loop body
LE: loop exit
PB: predicated region body
PF: predicated region fallthrough
CT: control target
= control target key end

     0   :  { %s1265_s1 = inlined_call_operand.vmem [shape: bf16[256,128], index: 1, kind: input, shape index: {}]   ;;  %s1266_s0 = inlined_call_operand.vmem [shape: bf16[4,50,256], index: 0, kind: input, shape index: {}]   ;;  %s1267_s2 = inlined_call_operand.vmem [shape: f32[1,128], index: 2, kind: input, shape index: {}]   ;;  %s1268_s3 = inlined_call_operand.vmem [shape: bf16[50,128], index: 3, kind: output, shape index: {}]  }
   0x1   :  { %v921_v0 = vld [vmem:[%s1265_s1 + $0x40] sm:$0xff]   ;;  %v923_v2 = vld [vmem:[%s1265_s1 + $0x48] sm:$0xff]   ;;  %v925_v4 = vld [vmem:[%s1265_s1 + $0x50] sm:$0xff]  }
   0x2   :  { %v922_v1 = vld [vmem:[%s1265_s1] sm:$0xff]   ;;  %761 = vmatprep.subr.bf16.mxu0 %v921_v0  ;;  %801 = vmatprep.subr.bf16.mxu1 %v921_v0  ;;  %v924_v3 = vld [vmem:[%s1265_s1 + $0x8] sm:$0xff]   ;;  %v1019_v5 = vld [vmem:[%s1265_s1 + $0x10] sm:$0xff]  }
   0x3   :  { %762 = vmatpush3.bf16.msra.mxu0 %v922_v1  ;;  %802 = vmatpush3.bf16.msra.mxu1 %v922_v1  ;;  %v1024_v6 = vld [vmem:[%s1265_s1 + $0x58] sm:$0xff]   ;;  %v1038_v8 = vld [vmem:[%s1265_s1 + $0x60] sm:$0xff]   ;;  %v1052_v10 = vld [vmem:[%s1265_s1 + $0x68] sm:$0xff]  }
   0x4   :  { %763 = vmatprep.subr.bf16.mxu0 %v923_v2  ;;  %803 = vmatprep.subr.bf16.mxu1 %v923_v2  ;;  %v1031_v7 = vld [vmem:[%s1265_s1 + $0x18] sm:$0xff]   ;;  %v1045_v9 = vld [vmem:[%s1265_s1 + $0x20] sm:$0xff]   ;;  %v1065_v13 = vld [vmem:[%s1265_s1 + $0x28] sm:$0xff]  }
   0x5   :  { %v939_v11 = vld [vmem:[%s1266_s0 + $0x4] ss:$8 sps:$4 sm:$0xff]   ;;  %v1072_v14 = vld [vmem:[%s1265_s1 + $0x70] sm:$0xff]   ;;  %v1086_v16 = vld [vmem:[%s1265_s1 + $0x78] sm:$0xff]  }
   0x6   :  { %v942_v12 = vld [vmem:[%s1266_s0 + $0x3c] ss:$8 sps:$4 sm:$0xff]   ;;  %219 = vmatprep.mubr.bf16.mxu0 %v939_v11  ;;  %v1079_v15 = vld [vmem:[%s1265_s1 + $0x30] sm:$0xff]   ;;  %v937_v18 = vld [vmem:[%s1266_s0] ss:$8 sps:$4 sm:$0xff]  }
   0x7   :  { %764 = vmatpush3.bf16.msra.mxu0 %v924_v3  ;;  %804 = vmatpush3.bf16.msra.mxu1 %v924_v3  ;;  %v1093_v17 = vld [vmem:[%s1265_s1 + $0x38] sm:$0xff]   ;;  %v945_v21 = vld [vmem:[%s1266_s0 + $0x4c] ss:$8 sps:$4 sm:$0xff]   ;;  %v948_v23 = vld [vmem:[%s1266_s0 + $0x48] ss:$8 sps:$4 sm:$0xff]  }
   0x8   :  { %765 = vmatprep.subr.bf16.mxu0 %v925_v4  ;;  %805 = vmatprep.subr.bf16.mxu1 %v925_v4  ;;  %v940_v19 = vld [vmem:[%s1266_s0 + $0x38] ss:$8 sps:$4 sm:$0xff]   ;;  %v943_v20 = vld [vmem:[%s1266_s0 + $0x14] ss:$8 sps:$4 sm:$0xff]   ;;  %v949_v24 = vld [vmem:[%s1266_s0 + $0x24] ss:$8 sps:$4 sm:$0xff]  }
   0x9   :  { %328 = vmatprep.mubr.bf16.mxu1 %v942_v12  ;;  %v947_v22 = vld [vmem:[%s1266_s0 + $0x10] ss:$8 sps:$4 sm:$0xff]   ;;  %v951_v25 = vld [vmem:[%s1266_s0 + $0x5c] ss:$8 sps:$4 sm:$0xff]   ;;  %v953_v26 = vld [vmem:[%s1266_s0 + $0x20] ss:$8 sps:$4 sm:$0xff]  }
   0xa   :  { %v954_v27 = vld [vmem:[%s1266_s0 + $0x58] ss:$8 sps:$4 sm:$0xff]   ;;  %v53_v28 = vld [vmem:[%s1266_s0 + $0x30] sm:$0x11]  ;;  %v690_v29 = vld [vmem:[%s1266_s0 + $0x68] sm:$0x11] }
   0xb   :  { %766 = vmatpush3.bf16.msra.mxu0 %v1019_v5  ;;  %806 = vmatpush3.bf16.msra.mxu1 %v1019_v5  ;;  %v667_v30 = vcombine.high %v53_v28, %v53_v28  ;;  %v698_v31 = vcombine.high %v690_v29, %v690_v29  ;;  %v666_v32 = vcombine.low %v53_v28, %v53_v28  ;;  %v961_v34 = vld [vmem:[%s1266_s0 + $0x74] ss:$8 sps:$4 sm:$0xff]   ;;  %v959_v36 = vld [vmem:[%s1266_s0 + $0x70] ss:$8 sps:$4 sm:$0xff]   ;;  %v965_v38 = vld [vmem:[%s1266_s0 + $0x84] ss:$8 sps:$4 sm:$0xff]  }
   0xc   :  { %767 = vmatprep.subr.bf16.mxu0 %v1024_v6  ;;  %807 = vmatprep.subr.bf16.mxu1 %v1024_v6  ;;  %v697_v33 = vcombine.low %v690_v29, %v690_v29  ;;  %v964_v35 = vld [vmem:[%s1266_s0 + $0xac] ss:$8 sps:$4 sm:$0xff]   ;;  %v962_v37 = vld [vmem:[%s1266_s0 + $0xa8] ss:$8 sps:$4 sm:$0xff]   ;;  %v967_v39 = vld [vmem:[%s1266_s0 + $0xbc] ss:$8 sps:$4 sm:$0xff]  }
   0xd   :  { %v969_v40 = vld [vmem:[%s1266_s0 + $0x80] ss:$8 sps:$4 sm:$0xff]   ;;  %v971_v42 = vld [vmem:[%s1266_s0 + $0x94] ss:$8 sps:$4 sm:$0xff]   ;;  %v975_v46 = vld [vmem:[%s1266_s0 + $0x90] ss:$8 sps:$4 sm:$0xff]  }
   0xe   :  { %v970_v41 = vld [vmem:[%s1266_s0 + $0xb8] ss:$8 sps:$4 sm:$0xff]   ;;  %v973_v43 = vld [vmem:[%s1266_s0 + $0xcc] ss:$8 sps:$4 sm:$0xff]   ;;  %v976_v47 = vld [vmem:[%s1266_s0 + $0xc8] ss:$8 sps:$4 sm:$0xff]  }
   0xf   :  { %768 = vmatpush3.bf16.msra.mxu0 %v1031_v7  ;;  %808 = vmatpush3.bf16.msra.mxu1 %v1031_v7  ;;  %v705_v44 = vld [vmem:[%s1266_s0 + $0xa0] sm:$0x11]  ;;  %v720_v45 = vld [vmem:[%s1266_s0 + $0xd8] sm:$0x11] }
  0x10   :  { %769 = vmatprep.subr.bf16.mxu0 %v1038_v8  ;;  %809 = vmatprep.subr.bf16.mxu1 %v1038_v8  ;;  %v713_v48 = vcombine.high %v705_v44, %v705_v44  ;;  %v728_v49 = vcombine.high %v720_v45, %v720_v45  ;;  %v712_v50 = vcombine.low %v705_v44, %v705_v44 }
  0x11   :  { %v727_v51 = vcombine.low %v720_v45, %v720_v45 }
  0x13   :  { %770 = vmatpush3.bf16.msra.mxu0 %v1045_v9  ;;  %810 = vmatpush3.bf16.msra.mxu1 %v1045_v9 }
  0x14   :  { %771 = vmatprep.subr.bf16.mxu0 %v1052_v10  ;;  %811 = vmatprep.subr.bf16.mxu1 %v1052_v10 }
  0x17   :  { %772 = vmatpush3.bf16.msra.mxu0 %v1065_v13  ;;  %812 = vmatpush3.bf16.msra.mxu1 %v1065_v13 }
  0x18   :  { %773 = vmatprep.subr.bf16.mxu0 %v1072_v14  ;;  %813 = vmatprep.subr.bf16.mxu1 %v1072_v14 }
  0x1b   :  { %774 = vmatpush3.bf16.msra.mxu0 %v1079_v15  ;;  %814 = vmatpush3.bf16.msra.mxu1 %v1079_v15 }
  0x1c   :  { %775 = vmatprep.subr.bf16.mxu0 %v1086_v16  ;;  %815 = vmatprep.subr.bf16.mxu1 %v1086_v16 }
  0x1f   :  { %776 = vmatpush3.bf16.msra.mxu0 %v1093_v17  ;;  %816 = vmatpush3.bf16.msra.mxu1 %v1093_v17 }
  0x20   :  { %841 = vmatprep.subr.bf16.mxu0 %v921_v0  ;;  %881 = vmatprep.subr.bf16.mxu1 %v921_v0 }
  0x22   :  { %220 = vmatmul.mubr.bf16.vlgmr.msra.gmra.mrb[0].mxu0 %v937_v18  ;;  %329 = vmatmul.mubr.bf16.vlgmr.msra.gmra.mrb[0].mxu1 %v940_v19 }
  0x23   :  { %842 = vmatpush3.bf16.msra.mxu0 %v922_v1  ;;  %882 = vmatpush3.bf16.msra.mxu1 %v922_v1 }
  0x24   :  { %843 = vmatprep.subr.bf16.mxu0 %v923_v2  ;;  %883 = vmatprep.subr.bf16.mxu1 %v923_v2 }
  0x25   :  { %227 = vmatprep.mubr.bf16.mxu0 %v943_v20  ;;  %336 = vmatprep.mubr.bf16.mxu1 %v945_v21 }
  0x27   :  { %844 = vmatpush3.bf16.msra.mxu0 %v924_v3  ;;  %884 = vmatpush3.bf16.msra.mxu1 %v924_v3 }
  0x28   :  { %845 = vmatprep.subr.bf16.mxu0 %v925_v4  ;;  %885 = vmatprep.subr.bf16.mxu1 %v925_v4 }
  0x2a   :  { %228 = vmatmul.mubr.bf16.gmra.mrb[4].mxu0 %v947_v22  ;;  %337 = vmatmul.mubr.bf16.gmra.mrb[4].mxu1 %v948_v23 }
  0x2b   :  { %846 = vmatpush3.bf16.msra.mxu0 %v1019_v5  ;;  %886 = vmatpush3.bf16.msra.mxu1 %v1019_v5 }
  0x2c   :  { %847 = vmatprep.subr.bf16.mxu0 %v1024_v6  ;;  %887 = vmatprep.subr.bf16.mxu1 %v1024_v6 }
  0x2d   :  { %235 = vmatprep.mubr.bf16.mxu0 %v949_v24  ;;  %344 = vmatprep.mubr.bf16.mxu1 %v951_v25 }
  0x2f   :  { %848 = vmatpush3.bf16.msra.mxu0 %v1031_v7  ;;  %888 = vmatpush3.bf16.msra.mxu1 %v1031_v7 }
  0x30   :  { %849 = vmatprep.subr.bf16.mxu0 %v1038_v8  ;;  %889 = vmatprep.subr.bf16.mxu1 %v1038_v8 }
  0x32   :  { %236 = vmatmul.mubr.bf16.gmra.mrb[8].mxu0 %v953_v26  ;;  %345 = vmatmul.mubr.bf16.gmra.mrb[8].mxu1 %v954_v27 }
  0x33   :  { %850 = vmatpush3.bf16.msra.mxu0 %v1045_v9  ;;  %890 = vmatpush3.bf16.msra.mxu1 %v1045_v9 }
  0x34   :  { %851 = vmatprep.subr.bf16.mxu0 %v1052_v10  ;;  %891 = vmatprep.subr.bf16.mxu1 %v1052_v10 }
  0x35   :  { %243 = vmatprep.mubr.bf16.mxu0 %v667_v30  ;;  %352 = vmatprep.mubr.bf16.mxu1 %v698_v31 }
  0x37   :  { %852 = vmatpush3.bf16.msra.mxu0 %v1065_v13  ;;  %892 = vmatpush3.bf16.msra.mxu1 %v1065_v13 }
  0x38   :  { %853 = vmatprep.subr.bf16.mxu0 %v1072_v14  ;;  %893 = vmatprep.subr.bf16.mxu1 %v1072_v14 }
  0x3a   :  { %244 = vmatmul.mubr.bf16.gmra.mrb[12].mxu0 %v666_v32  ;;  %353 = vmatmul.mubr.bf16.gmra.mrb[12].mxu1 %v697_v33 }
  0x3b   :  { %854 = vmatpush3.bf16.msra.mxu0 %v1079_v15  ;;  %894 = vmatpush3.bf16.msra.mxu1 %v1079_v15 }
  0x3c   :  { %855 = vmatprep.subr.bf16.mxu0 %v1086_v16  ;;  %895 = vmatprep.subr.bf16.mxu1 %v1086_v16 }
  0x3d   :  { %444 = vmatprep.mubr.bf16.mxu0 %v961_v34  ;;  %560 = vmatprep.mubr.bf16.mxu1 %v964_v35 }
  0x3f   :  { %856 = vmatpush3.bf16.msra.mxu0 %v1093_v17  ;;  %896 = vmatpush3.bf16.msra.mxu1 %v1093_v17 }
  0x42   :  { %445 = vmatmul.mubr.bf16.vlgmr.msra.gmra.mrb[16].mxu0 %v959_v36  ;;  %561 = vmatmul.mubr.bf16.vlgmr.msra.gmra.mrb[16].mxu1 %v962_v37 }
  0x43   :  { %452 = vmatprep.mubr.bf16.mxu0 %v965_v38  ;;  %568 = vmatprep.mubr.bf16.mxu1 %v967_v39 }
  0x4a   :  { %453 = vmatmul.mubr.bf16.gmra.mrb[20].mxu0 %v969_v40  ;;  %569 = vmatmul.mubr.bf16.gmra.mrb[20].mxu1 %v970_v41 }
  0x4b   :  { %460 = vmatprep.mubr.bf16.mxu0 %v971_v42  ;;  %576 = vmatprep.mubr.bf16.mxu1 %v973_v43 }
  0x52   :  { %461 = vmatmul.mubr.bf16.gmra.mrb[24].mxu0 %v975_v46  ;;  %577 = vmatmul.mubr.bf16.gmra.mrb[24].mxu1 %v976_v47 }
  0x53   :  { %468 = vmatprep.mubr.bf16.mxu0 %v713_v48  ;;  %584 = vmatprep.mubr.bf16.mxu1 %v728_v49 }
  0x5a   :  { %469 = vmatmul.mubr.bf16.gmra.mrb[28].mxu0 %v712_v50  ;;  %585 = vmatmul.mubr.bf16.gmra.mrb[28].mxu1 %v727_v51 }
  0xf5   :  { %v777_v52 = vpop.f32.mrb[0].mxu0  ;;  %v817_v53 = vpop.f32.mrb[0].mxu1 }
  0xf6   :  { %v778_v54 = vpop.f32.mrb[1].mxu0  ;;  %v818_v55 = vpop.f32.mrb[1].mxu1 }
  0xf7   :  { %v779_v56 = vadd.f32 %v778_v54, %v777_v52  ;;  %v819_v57 = vadd.f32 %v818_v55, %v817_v53  ;;  %v780_v58 = vpop.f32.mrb[2].mxu0  ;;  %v820_v59 = vpop.f32.mrb[2].mxu1  ;;  %v1232_v54 = vld [vmem:[%s1267_s2] ss:$0 sm:$0xff] }
  0xf8   :  { %v781_v60 = vpop.f32.mrb[3].mxu0  ;;  %v821_v61 = vpop.f32.mrb[3].mxu1 }
  0xf9   :  { %v360_v62 = vmax.f32 %v779_v56, %v819_v57  ;;  %v782_v63 = vadd.f32 %v781_v60, %v780_v58  ;;  %v822_v0 = vadd.f32 %v821_v61, %v820_v59 }
  0xfb   :  { %v361_v1 = vmax.f32 %v782_v63, %v822_v0 }
  0xfd   :  { %v783_v2 = vpop.f32.mrb[4].mxu0  ;;  %v823_v3 = vpop.f32.mrb[4].mxu1 }
  0xfe   :  { %v784_v4 = vpop.f32.mrb[5].mxu0  ;;  %v824_v5 = vpop.f32.mrb[5].mxu1 }
  0xff   :  { %v1199_v6 = vadd.f32 %v784_v4, %v783_v2  ;;  %v1201_v7 = vadd.f32 %v824_v5, %v823_v3  ;;  %v786_v8 = vpop.f32.mrb[6].mxu0  ;;  %v826_v9 = vpop.f32.mrb[6].mxu1 }
 0x100   :  { %v787_v10 = vpop.f32.mrb[7].mxu0  ;;  %v827_v11 = vpop.f32.mrb[7].mxu1 }
 0x101   :  { %v362_v12 = vmax.f32 %v1199_v6, %v1201_v7  ;;  %v1205_v13 = vadd.f32 %v787_v10, %v786_v8  ;;  %v1207_v14 = vadd.f32 %v827_v11, %v826_v9 }
 0x103   :  { %v363_v15 = vmax.f32 %v1205_v13, %v1207_v14 }
 0x105   :  { %v789_v16 = vpop.f32.mrb[8].mxu0  ;;  %v829_v17 = vpop.f32.mrb[8].mxu1 }
 0x106   :  { %v790_v18 = vpop.f32.mrb[9].mxu0  ;;  %v830_v19 = vpop.f32.mrb[9].mxu1 }
 0x107   :  { %v1211_v20 = vadd.f32 %v790_v18, %v789_v16  ;;  %v1213_v21 = vadd.f32 %v830_v19, %v829_v17  ;;  %v792_v22 = vpop.f32.mrb[10].mxu0  ;;  %v832_v23 = vpop.f32.mrb[10].mxu1 }
 0x108   :  { %v793_v24 = vpop.f32.mrb[11].mxu0  ;;  %v833_v25 = vpop.f32.mrb[11].mxu1 }
 0x109   :  { %v364_v26 = vmax.f32 %v1211_v20, %v1213_v21  ;;  %v1217_v27 = vadd.f32 %v793_v24, %v792_v22  ;;  %v1219_v28 = vadd.f32 %v833_v25, %v832_v23 }
 0x10b   :  { %v365_v29 = vmax.f32 %v1217_v27, %v1219_v28 }
 0x10d   :  { %v795_v30 = vpop.f32.mrb[12].mxu0  ;;  %v835_v31 = vpop.f32.mrb[12].mxu1 }
 0x10e   :  { %v796_v32 = vpop.f32.mrb[13].mxu0  ;;  %v836_v33 = vpop.f32.mrb[13].mxu1 }
 0x10f   :  { %v1223_v34 = vadd.f32 %v796_v32, %v795_v30  ;;  %v1225_v35 = vadd.f32 %v836_v33, %v835_v31  ;;  %v798_v36 = vpop.f32.mrb[14].mxu0  ;;  %v838_v37 = vpop.f32.mrb[14].mxu1 }
 0x110   :  { %v799_v38 = vpop.f32.mrb[15].mxu0  ;;  %v839_v39 = vpop.f32.mrb[15].mxu1 }
 0x111   :  { %v366_v40 = vmax.f32 %v1223_v34, %v1225_v35 }
 0x115   :  { %v857_v41 = vpop.f32.mrb[16].mxu0  ;;  %v897_v42 = vpop.f32.mrb[16].mxu1 }
 0x116   :  { %v858_v43 = vpop.f32.mrb[17].mxu0  ;;  %v898_v44 = vpop.f32.mrb[17].mxu1 }
 0x117   :  { %v859_v45 = vadd.f32 %v858_v43, %v857_v41  ;;  %v899_v46 = vadd.f32 %v898_v44, %v897_v42  ;;  %v860_v47 = vpop.f32.mrb[18].mxu0  ;;  %v900_v48 = vpop.f32.mrb[18].mxu1 }
 0x118   :  { %v861_v49 = vpop.f32.mrb[19].mxu0  ;;  %v901_v50 = vpop.f32.mrb[19].mxu1 }
 0x119   :  { %v476_v51 = vmax.f32 %v360_v62, %v859_v45  ;;  %v862_v52 = vadd.f32 %v861_v49, %v860_v47  ;;  %v902_v53 = vadd.f32 %v901_v50, %v900_v48 }
 0x11b   :  { %v592_v55 = vmax.f32 %v476_v51, %v899_v46  ;;  %v477_v56 = vmax.f32 %v361_v1, %v862_v52 }
 0x11d   :  { %v606_v57 = vadd.f32 %v1232_v54, %v592_v55  ;;  %v593_v58 = vmax.f32 %v477_v56, %v902_v53  ;;  %v863_v59 = vpop.f32.mrb[20].mxu0  ;;  %v903_v60 = vpop.f32.mrb[20].mxu1 }
 0x11e   :  { %v864_v61 = vpop.f32.mrb[21].mxu0  ;;  %v904_v63 = vpop.f32.mrb[21].mxu1 }
 0x11f   :  { %v607_v0 = vadd.f32 %v1232_v54, %v593_v58  ;;  %v865_v2 = vadd.f32 %v864_v61, %v863_v59  ;;  %v905_v62 = vadd.f32 %v904_v63, %v903_v60  ;;  %v866_v3 = vpop.f32.mrb[22].mxu0  ;;  %v906_v4 = vpop.f32.mrb[22].mxu1  ;;  %v613_v5 = vmax.f32 %v606_v57, 0.0 }
 0x120   :  { %v867_v6 = vpop.f32.mrb[23].mxu0  ;;  %v907_v7 = vpop.f32.mrb[23].mxu1 }
 0x121   :  { %v614_v8 = vmax.f32 %v607_v0, 0.0  ;;  %v478_v9 = vmax.f32 %v362_v12, %v865_v2  ;;  %v868_v10 = vadd.f32 %v867_v6, %v866_v3  ;;  %v908_v1 = vadd.f32 %v907_v7, %v906_v4 }
 0x123   :  { %v747_v11 = vpack.c.bf16 %v614_v8, %v613_v5  ;;  %v594_v16 = vmax.f32 %v478_v9, %v905_v62  ;;  %v479_v17 = vmax.f32 %v363_v15, %v868_v10 }
 0x125   :  { %748 = vst [vmem:[%s1268_s3] sm:$0xff] %v747_v11   ;;  %v608_v18 = vadd.f32 %v1232_v54, %v594_v16  ;;  %v595_v19 = vmax.f32 %v479_v17, %v908_v1  ;;  %v869_v22 = vpop.f32.mrb[24].mxu0  ;;  %v909_v23 = vpop.f32.mrb[24].mxu1 }
 0x126   :  { %v870_v24 = vpop.f32.mrb[25].mxu0  ;;  %v910_v25 = vpop.f32.mrb[25].mxu1 }
 0x127   :  { %v609_v12 = vadd.f32 %v1232_v54, %v595_v19  ;;  %v871_v30 = vadd.f32 %v870_v24, %v869_v22  ;;  %v911_v31 = vadd.f32 %v910_v25, %v909_v23  ;;  %v872_v32 = vpop.f32.mrb[26].mxu0  ;;  %v912_v33 = vpop.f32.mrb[26].mxu1  ;;  %v615_v36 = vmax.f32 %v608_v18, 0.0 }
 0x128   :  { %v873_v13 = vpop.f32.mrb[27].mxu0  ;;  %v913_v14 = vpop.f32.mrb[27].mxu1 }
 0x129   :  { %v616_v15 = vmax.f32 %v609_v12, 0.0  ;;  %v480_v37 = vmax.f32 %v364_v26, %v871_v30  ;;  %v874_v38 = vadd.f32 %v873_v13, %v872_v32  ;;  %v914_v39 = vadd.f32 %v913_v14, %v912_v33 }
 0x12b   :  { %v752_v41 = vpack.c.bf16 %v616_v15, %v615_v36  ;;  %v596_v42 = vmax.f32 %v480_v37, %v911_v31  ;;  %v481_v43 = vmax.f32 %v365_v29, %v874_v38 }
 0x12d   :  { %759 = vst [vmem:[%s1268_s3 + $0x8] sm:$0xff] %v752_v41   ;;  %v610_v44 = vadd.f32 %v1232_v54, %v596_v42  ;;  %v597_v45 = vmax.f32 %v481_v43, %v914_v39  ;;  %v875_v46 = vpop.f32.mrb[28].mxu0  ;;  %v915_v47 = vpop.f32.mrb[28].mxu1 }
 0x12e   :  { %v876_v48 = vpop.f32.mrb[29].mxu0  ;;  %v916_v20 = vpop.f32.mrb[29].mxu1 }
 0x12f   :  { %v611_v21 = vadd.f32 %v1232_v54, %v597_v45  ;;  %v877_v26 = vadd.f32 %v876_v48, %v875_v46  ;;  %v917_v49 = vadd.f32 %v916_v20, %v915_v47  ;;  %v878_v50 = vpop.f32.mrb[30].mxu0  ;;  %v918_v51 = vpop.f32.mrb[30].mxu1  ;;  %v617_v28 = vmax.f32 %v610_v44, 0.0 }
 0x130   :  { %v879_v52 = vpop.f32.mrb[31].mxu0  ;;  %v919_v27 = vpop.f32.mrb[31].mxu1 }
 0x131   :  { %v618_v29 = vmax.f32 %v611_v21, 0.0  ;;  %v482_v53 = vmax.f32 %v366_v40, %v877_v26 }
 0x133   :  { %v757_v55 = vpack.c.bf16 %v618_v29, %v617_v28  ;;  %v598_v56 = vmax.f32 %v482_v53, %v917_v49 }
 0x135   :  { %760 = vst [vmem:[%s1268_s3 + $0x10] sm:$0xff] %v757_v55   ;;  %v612_v57 = vadd.f32 %v1232_v54, %v598_v56 }
 0x137   :  { %v619_v58 = vmax.f32 %v612_v57, 0.0 }
 0x139   :  { %v743_v59 = vpack.c.bf16 %v619_v58, %v619_v58 }
 0x13b   :  { %655 = vst [vmem:[%s1268_s3 + $0x18] sm:$0x1] %v743_v59 }

// kernel: net_forward.5
= control target key start
LH: loop header
LB: loop body
LE: loop exit
PB: predicated region body
PF: predicated region fallthrough
CT: control target
= control target key end

     0   :  { %v785_v1 = vmov 0   ;;  %v98_v20 = vlaneseq  ;;  %v786_v25 = vmov 1966171168   ;;  %vm264_vm0 = vcmask 130048   ;;  %s1004_s0 = inlined_call_operand.vmem [shape: bf16[2,400], index: 0, kind: input, shape index: {}]   ;;  %s1005_s1 = inlined_call_operand.vmem [shape: bf16[400,128], index: 1, kind: input, shape index: {}]   ;;  %s1006_s2 = inlined_call_operand.vmem [shape: f32[1,128], index: 2, kind: input, shape index: {}]   ;;  %s1007_s3 = inlined_call_operand.vmem [shape: bf16[128,128], index: 3, kind: input, shape index: {}]   ;;  %s1008_s4 = inlined_call_operand.vmem [shape: f32[1,128], index: 4, kind: input, shape index: {}]   ;;  %s1009_s5 = inlined_call_operand.vmem [shape: bf16[128,128], index: 5, kind: input, shape index: {}]   ;;  %s1010_s6 = inlined_call_operand.vmem [shape: f32[1,128], index: 6, kind: input, shape index: {}]   ;;  %s1011_s7 = inlined_call_operand.hbm [shape: f32[2,128], index: 7, kind: output, shape index: {}]  }
   0x1   :  { %v720_v0 = vld [vmem:[%s1005_s1 + $0x40] sm:$0xff]   ;;  %308 = vmatprep.subr.bf16.mxu1 %v785_v1  ;;  %v723_v4 = vld [vmem:[%s1005_s1 + $0x48] sm:$0xff]   ;;  %v726_v7 = vld [vmem:[%s1005_s1 + $0x50] sm:$0xff]   ;;  %v96_v26 = vunpack.c.l.s4 %v786_v25  ;;  %v787_v38 = vmov 0.0  }
   0x2   :  { %v721_v2 = vld [vmem:[%s1005_s1 + $0x80] sm:$0xff]   ;;  %635 = vmatprep.subr.bf16.mxu0 %v720_v0  ;;  %v724_v5 = vld [vmem:[%s1005_s1 + $0x88] sm:$0xff]   ;;  %v727_v8 = vld [vmem:[%s1005_s1 + $0x90] sm:$0xff]   ;;  %v99_v27 = vshrl.u32 %v98_v20, 7 }
   0x3   :  { %v722_v3 = vld [vmem:[%s1005_s1] sm:$0xff]   ;;  %309 = vmatpush1.bf16.msra.mxu1 %v721_v2  ;;  %v725_v6 = vld [vmem:[%s1005_s1 + $0x8] sm:$0xff]   ;;  %v728_v9 = vld [vmem:[%s1005_s1 + $0x10] sm:$0xff]   ;;  %v97_v30 = vunpack.c.0.s8 %v96_v26 }
   0x4   :  { %636 = vmatpush3.bf16.msra.mxu0 %v722_v3  ;;  %310 = vmatprep.subr.bf16.mxu1 %v785_v1  ;;  %v729_v10 = vld [vmem:[%s1005_s1 + $0x58] sm:$0xff]   ;;  %v732_v13 = vld [vmem:[%s1005_s1 + $0x60] sm:$0xff]   ;;  %v735_v16 = vld [vmem:[%s1005_s1 + $0x68] sm:$0xff]  }
   0x5   :  { %637 = vmatprep.subr.bf16.mxu0 %v723_v4  ;;  %v730_v11 = vld [vmem:[%s1005_s1 + $0x98] sm:$0xff]   ;;  %v733_v14 = vld [vmem:[%s1005_s1 + $0xa0] sm:$0xff]   ;;  %v736_v17 = vld [vmem:[%s1005_s1 + $0xa8] sm:$0xff]   ;;  %v100_v32 = vsub.s32 %v97_v30, %v99_v27 }
   0x6   :  { %v731_v12 = vld [vmem:[%s1005_s1 + $0x18] sm:$0xff]   ;;  %v734_v15 = vld [vmem:[%s1005_s1 + $0x20] sm:$0xff]   ;;  %v737_v18 = vld [vmem:[%s1005_s1 + $0x28] sm:$0xff]  }
   0x7   :  { %311 = vmatpush1.bf16.msra.mxu1 %v724_v5  ;;  %v738_v19 = vld [vmem:[%s1005_s1 + $0x70] sm:$0xff]   ;;  %v590_v23 = vld.sshfl [vmem:[%s1004_s0] sm:$0x33 pattern:$0x75316420]  ;;  %v741_v24 = vld [vmem:[%s1005_s1 + $0x78] sm:$0xff]  }
   0x8   :  { %638 = vmatpush3.bf16.msra.mxu0 %v725_v6  ;;  %312 = vmatprep.subr.bf16.mxu1 %v785_v1  ;;  %v739_v21 = vld [vmem:[%s1005_s1 + $0xb0] sm:$0xff]   ;;  %v742_v28 = vld [vmem:[%s1005_s1 + $0xb8] sm:$0xff]   ;;  %v94_v29 = vcombine.high %v590_v23, %v590_v23  ;;  %v744_v33 = vld [vmem:[%s1005_s1 + $0xc0] sm:$0xff]   ;;  %v101_v36 = vrot.slane %v590_v23, %v100_v32 }
   0x9   :  { %639 = vmatprep.subr.bf16.mxu0 %v726_v7  ;;  %v740_v22 = vld [vmem:[%s1005_s1 + $0x30] sm:$0xff]   ;;  %v743_v31 = vld [vmem:[%s1005_s1 + $0x38] sm:$0xff]   ;;  %v745_v34 = vld [vmem:[%s1007_s3] sm:$0xff]  }
   0xa   :  { %v108_v35 = vrot.slane %v94_v29, %v100_v32  ;;  %v109_v39 = vcombine.high %v101_v36, %v101_v36  ;;  %v746_v40 = vld [vmem:[%s1007_s3 + $0x8] sm:$0xff]  }
   0xb   :  { %313 = vmatpush1.bf16.msra.mxu1 %v727_v8 }
   0xc   :  { %640 = vmatpush3.bf16.msra.mxu0 %v728_v9  ;;  %314 = vmatprep.subr.bf16.mxu1 %v785_v1  ;;  %v110_v37 = vcombine.high %v108_v35, %v108_v35 }
   0xd   :  { %641 = vmatprep.subr.bf16.mxu0 %v729_v10  ;;  %300 = vmatprep.mubr.bf16.mxu0 %v108_v35 }
   0xe   :  { %616 = vmatprep.mubr.msk.bf16.mxu1 %vm264_vm0, %v110_v37 }
   0xf   :  { %315 = vmatpush1.bf16.msra.mxu1 %v730_v11 }
  0x10   :  { %642 = vmatpush3.bf16.msra.mxu0 %v731_v12  ;;  %316 = vmatprep.subr.bf16.mxu1 %v785_v1 }
  0x11   :  { %643 = vmatprep.subr.bf16.mxu0 %v732_v13 }
  0x13   :  { %317 = vmatpush1.bf16.msra.mxu1 %v733_v14 }
  0x14   :  { %644 = vmatpush3.bf16.msra.mxu0 %v734_v15  ;;  %318 = vmatprep.subr.bf16.mxu1 %v785_v1 }
  0x15   :  { %645 = vmatprep.subr.bf16.mxu0 %v735_v16 }
  0x17   :  { %319 = vmatpush1.bf16.msra.mxu1 %v736_v17 }
  0x18   :  { %646 = vmatpush3.bf16.msra.mxu0 %v737_v18  ;;  %320 = vmatprep.subr.bf16.mxu1 %v785_v1 }
  0x19   :  { %647 = vmatprep.subr.bf16.mxu0 %v738_v19 }
  0x1b   :  { %321 = vmatpush1.bf16.msra.mxu1 %v739_v21 }
  0x1c   :  { %648 = vmatpush3.bf16.msra.mxu0 %v740_v22  ;;  %322 = vmatprep.subr.bf16.mxu1 %v785_v1 }
  0x1d   :  { %649 = vmatprep.subr.bf16.mxu0 %v741_v24 }
  0x1f   :  { %323 = vmatpush1.bf16.msra.mxu1 %v742_v28 }
  0x20   :  { %650 = vmatpush3.bf16.msra.mxu0 %v743_v31  ;;  %324 = vmatprep.subr.bf16.mxu1 %v785_v1 }
  0x21   :  { %675 = vmatprep.subr.bf16.mxu0 %v787_v38 }
  0x23   :  { %301 = vmatmul.mubr.bf16.vlgmr.msra.gmra.mrb[0].mxu0 %v101_v36  ;;  %325 = vmatpush1.bf16.msra.mxu1 %v744_v33 }
  0x24   :  { %676 = vmatpush3.bf16.msra.mxu0 %v745_v34  ;;  %695 = vmatprep.subr.bf16.mxu1 %v787_v38 }
  0x25   :  { %677 = vmatprep.subr.bf16.mxu0 %v787_v38 }
  0x26   :  { %341 = vmatmul.mubr.bf16.vlgmr.msra.gmra.mrb[0].mxu1 %v109_v39 }
  0x27   :  { %12 = vsyncpa [#allocation3], 0  ;;  %v747_v41 = vld [vmem:[%s1007_s3 + $0x10] sm:$0xff]   ;;  %v748_v42 = vld [vmem:[%s1007_s3 + $0x18] sm:$0xff]   ;;  %vm788_vm1 = vmmov 0   ;;  %s789_s16 = smov [#allocation2]  }
  0x28   :  { %678 = vmatpush3.bf16.msra.mxu0 %v746_v40  ;;  %v749_v43 = vld [vmem:[%s1007_s3 + $0x20] sm:$0xff]   ;;  %v750_v44 = vld [vmem:[%s1007_s3 + $0x28] sm:$0xff]   ;;  %v751_v45 = vld [vmem:[%s1007_s3 + $0x30] sm:$0xff]   ;;  %691 = vmatprep.mubr.msk.bf16.mxu0 %vm788_vm1, %v787_v38  ;;  %s581_s17 = sshll.u32 %s789_s16, 4  ;;  %s582_s17 = int_to_ptr.vmem [resolvable:$true] %s581_s17 }
  0x29   :  { %679 = vmatprep.subr.bf16.mxu0 %v787_v38  ;;  %v752_v46 = vld [vmem:[%s1007_s3 + $0x38] sm:$0xff]   ;;  %711 = vmatprep.mubr.msk.bf16.mxu1 %vm788_vm1, %v787_v38  ;;  %v753_v47 = vld [vmem:[%s1009_s5] sm:$0xff]   ;;  %v754_v48 = vld [vmem:[%s1009_s5 + $0x8] sm:$0xff]   ;;  %p766_p1 = scmp.lt.s32.totalorder %s582_s17, %s582_s17 }
  0x2a   :  { %696 = vmatpush3.bf16.msra.mxu1 %v753_v47  ;;  %v755_v49 = vld [vmem:[%s1009_s5 + $0x10] sm:$0xff]   ;;  %v756_v50 = vld [vmem:[%s1009_s5 + $0x18] sm:$0xff]   ;;  %v757_v51 = vld [vmem:[%s1009_s5 + $0x20] sm:$0xff]  }
  0x2b   :  { %697 = vmatprep.subr.bf16.mxu1 %v787_v38  ;;  %v758_v52 = vld [vmem:[%s1009_s5 + $0x28] sm:$0xff]   ;;  %v589_v55 = vld [vmem:[%s1006_s2] ss:$0 sm:$0xff]  ;;  %v759_v3 = vld [vmem:[%s1009_s5 + $0x30] sm:$0xff]  }
  0x2c   :  { %680 = vmatpush3.bf16.msra.mxu0 %v747_v41  ;;  %v760_v4 = vld [vmem:[%s1009_s5 + $0x38] sm:$0xff]   ;;  %v617_v5 = vld [vmem:[%s1008_s4] ss:$0 sm:$0xff]  ;;  %s761_s4 = scalar_lea.vmem %s582_s17, 32 }
  0x2d   :  { %681 = vmatprep.subr.bf16.mxu0 %v787_v38  ;;  %v626_v13 = vld [vmem:[%s1010_s6] ss:$0 sm:$0xff]  ;;  %p762_p0 = scmp.ne.s32.totalorder %s582_s17, %s761_s4  ;;  %p767_p2 = scmp.lt.s32.totalorder %s761_s4, %s761_s4 }
  0x2e   :  { %698 = vmatpush3.bf16.msra.mxu1 %v754_v48 }
  0x2f   :  { %699 = vmatprep.subr.bf16.mxu1 %v787_v38  ;;  %p768_p3 = por %p767_p2, %p766_p1 }
  0x30   :  { %682 = vmatpush3.bf16.msra.mxu0 %v748_v42 }
  0x31   :  { %683 = vmatprep.subr.bf16.mxu0 %v787_v38  ;;  %p769_p4 = pnand %p768_p3, %p762_p0 }
  0x32   :  { %700 = vmatpush3.bf16.msra.mxu1 %v755_v49 }
  0x33   :  { %701 = vmatprep.subr.bf16.mxu1 %v787_v38 }
  0x34   :  { %684 = vmatpush3.bf16.msra.mxu0 %v749_v43 }
  0x35   :  { %685 = vmatprep.subr.bf16.mxu0 %v787_v38 }
  0x36   :  { %702 = vmatpush3.bf16.msra.mxu1 %v756_v50 }
  0x37   :  { %703 = vmatprep.subr.bf16.mxu1 %v787_v38 }
  0x38   :  { %686 = vmatpush3.bf16.msra.mxu0 %v750_v44 }
  0x39   :  { %687 = vmatprep.subr.bf16.mxu0 %v787_v38 }
  0x3a   :  { %704 = vmatpush3.bf16.msra.mxu1 %v757_v51 }
  0x3b   :  { %705 = vmatprep.subr.bf16.mxu1 %v787_v38 }
  0x3c   :  { %688 = vmatpush3.bf16.msra.mxu0 %v751_v45 }
  0x3d   :  { %689 = vmatprep.subr.bf16.mxu0 %v787_v38 }
  0x3e   :  { %706 = vmatpush3.bf16.msra.mxu1 %v758_v52 }
  0x3f   :  { %707 = vmatprep.subr.bf16.mxu1 %v787_v38 }
  0x40   :  { %690 = vmatpush3.bf16.msra.mxu0 %v752_v46 }
  0x42   :  { %708 = vmatpush3.bf16.msra.mxu1 %v759_v3 }
  0x43   :  { %709 = vmatprep.subr.bf16.mxu1 %v787_v38 }
  0x46   :  { %710 = vmatpush3.bf16.msra.mxu1 %v760_v4 }
  0xf6   :  { %v651_v53 = vpop.f32.mrb[0].mxu0 }
  0xf7   :  { %v652_v54 = vpop.f32.mrb[1].mxu0 }
  0xf8   :  { %v653_v56 = vadd.f32 %v652_v54, %v651_v53  ;;  %v654_v57 = vpop.f32.mrb[2].mxu0 }
  0xf9   :  { %v655_v58 = vpop.f32.mrb[3].mxu0  ;;  %v342_v59 = vpop.f32.mrb[0].mxu1 }
  0xfa   :  { %v303_v60 = vadd.f32 %v653_v56, %v589_v55  ;;  %v344_v61 = vpop.f32.mrb[1].mxu1 }
  0xfb   :  { %v345_v62 = vpop.f32.mrb[2].mxu1 }
  0xfc   :  { %v343_v63 = vadd.f32 %v342_v59, %v303_v60  ;;  %v346_v0 = vpop.f32.mrb[3].mxu1 }
  0xfe   :  { %v348_v1 = vmax.f32 %v343_v63, 0.0 }
 0x100   :  { %v349_v2 = vpack.c.bf16 %v348_v1, %v348_v1 }
 0x102   :  { %692 = vmatmul.mubr.bf16.vlgmr.msra.gmra.mrb[4].mxu0 %v349_v2 }
 0x1d5   :  { %v455_v6 = vpop.f32.mrb[4].mxu0 }
 0x1d6   :  { %v456_v7 = vadd.f32 %v617_v5, %v455_v6  ;;  %v693_v8 = vpop.f32.mrb[5].mxu0 }
 0x1d7   :  { %v458_v9 = vpop.f32.mrb[6].mxu0 }
 0x1d8   :  { %v461_v10 = vmax.f32 %v456_v7, 0.0  ;;  %v694_v11 = vpop.f32.mrb[7].mxu0 }
 0x1da   :  { %v462_v12 = vpack.c.bf16 %v461_v10, %v461_v10 }
 0x1dc   :  { %712 = vmatmul.mubr.bf16.vlgmr.msra.gmra.mrb[4].mxu1 %v462_v12 }
 0x2af   :  { %v568_v14 = vpop.f32.mrb[4].mxu1 }
 0x2b0   :  { %v569_v15 = vadd.f32 %v626_v13, %v568_v14  ;;  %v713_v16 = vpop.f32.mrb[5].mxu1 }
 0x2b1   :  { %v571_v17 = vpop.f32.mrb[6].mxu1 }
 0x2b2   :  { %574 = vst [vmem:[#allocation2] sm:$0x3] %v569_v15  ;;  %v714_v18 = vpop.f32.mrb[7].mxu1 }
 0x2b3   :  { %772 = shalt.err (!%p769_p4)
}
 0x2b4   :  { %s773_s6 = scalar_lea.hbm %s1011_s7, 32 }
 0x2b5   :  { %p774_p5 = scmp.ne.s32.totalorder %s1011_s7, %s773_s6  ;;  %p777_p6 = scmp.lt.u32.totalorder %s773_s6, %s1011_s7 }
 0x2b7   :  { %p779_p7 = pnand %p777_p6, %p774_p5 }
 0x2b9   :  { %782 = shalt.err (!%p779_p7)
}
 0x2ba   :  { %584 = dma.vmem_to_hbm [thread:$0]  %s582_s17, 32, %s1011_s7, [#allocation3]  }
 0x2bb   :  { %783 = dma.done.wait [#allocation3], 32  }
 0x2bc   :  { %784 = vsyncadd [#allocation3], 4294967264 }
 0x2bd   :  { %588 = vsyncpa [#allocation3], 1 }

</bundles_post_ra>
